<compile_context>
chip_gen: v6e
topology: v6e:2x2x1
jax: 0.10.0
libtpu: 0.0.40
codegen_flags: <defaults>
</compile_context>

<pallas_src>
import math

import jax
import jax.numpy as jnp
from jax import lax
from jax.experimental import pallas as pl
from jax.experimental.pallas import tpu as pltpu

_INV_SQRT2 = 1.0 / math.sqrt(2.0)
_HAS_BUFFERED = hasattr(pl, "Buffered")


def _round_up(x, m):
    return ((x + m - 1) // m) * m


def _vmem_capacity_bytes():
    """Physical VMEM per TensorCore, with a conservative fallback (v7x = 64 MiB/TC)."""
    try:
        info = pltpu.get_tpu_info()
        for attr in ("vmem_capacity_bytes", "vmem_size_bytes", "vmem_bytes"):
            v = getattr(info, attr, None)
            if v:
                return int(v)
    except Exception:
        pass
    return 64 * 1024 * 1024


def _resident_vmem_estimate(tm, dim, hidden, x_item, w_item, o_item, single_buffer):
    nbuf = 1 if single_buffer else 2
    weights = nbuf * (2 * dim * hidden + 2 * hidden + hidden * dim + dim) * w_item
    io = 2 * tm * dim * x_item + 2 * tm * dim * o_item          # double-buffered x / out tiles
    inter = 3 * tm * hidden * 4                                  # a, g, z live f32 intermediates
    return weights + io + inter


def _tiled_vmem_estimate(tm, dim, th, x_item, w_item, o_item):
    weights = 2 * (2 * dim * th + 2 * th + th * dim) * w_item + 2 * dim * w_item
    io = 2 * tm * dim * x_item + 2 * tm * dim * o_item
    acc = tm * dim * 4
    inter = 3 * tm * th * 4
    return weights + io + acc + inter


# ---------------------------------------------------------------------------
# Kernels
# ---------------------------------------------------------------------------
def _ffn_kernel_resident(x_ref, w1a_ref, w1g_ref, b1a_ref, b1g_ref, w2_ref, b2_ref, o_ref):
    # x_ref: (tm, dim); w1a/w1g: (dim, hidden); b1a/b1g: (1, hidden)
    # w2_ref: (hidden, dim); b2_ref: (1, dim); o_ref: (tm, dim)
    x = x_ref[...]  # native dtype straight into the MXU, f32 accumulation below

    a = jnp.dot(x, w1a_ref[...], preferred_element_type=jnp.float32) \
        + b1a_ref[...].astype(jnp.float32)
    g = jnp.dot(x, w1g_ref[...], preferred_element_type=jnp.float32) \
        + b1g_ref[...].astype(jnp.float32)

    # GEGLU: value * gelu(gate), exact erf GELU (PyTorch default). erf is VPU polynomial work.
    gelu_g = 0.5 * g * (1.0 + lax.erf(g * _INV_SQRT2))
    z = (a * gelu_g).astype(w2_ref.dtype)

    # Dropout(p=0.0, eval) is identity.
    out = jnp.dot(z, w2_ref[...], preferred_element_type=jnp.float32) \
        + b2_ref[...].astype(jnp.float32)
    o_ref[...] = out.astype(o_ref.dtype)


def _ffn_kernel_tiled(x_ref, w1a_ref, w1g_ref, b1a_ref, b1g_ref, w2_ref, b2_ref, o_ref,
                      acc_ref):
    # Hidden-dim-tiled variant: grid=(M tiles, hidden tiles), hidden axis last ("arbitrary").
    # x_ref: (tm, dim); w1a/w1g: (dim, th); b1a/b1g: (1, th); w2_ref: (th, dim);
    # b2_ref: (1, dim); o_ref: (tm, dim); acc_ref: (tm, dim) f32 VMEM accumulator.
    h = pl.program_id(1)

    @pl.when(h == 0)
    def _():
        acc_ref[...] = jnp.zeros_like(acc_ref)

    x = x_ref[...]
    a = jnp.dot(x, w1a_ref[...], preferred_element_type=jnp.float32) \
        + b1a_ref[...].astype(jnp.float32)
    g = jnp.dot(x, w1g_ref[...], preferred_element_type=jnp.float32) \
        + b1g_ref[...].astype(jnp.float32)

    gelu_g = 0.5 * g * (1.0 + lax.erf(g * _INV_SQRT2))
    z = (a * gelu_g).astype(w2_ref.dtype)

    acc_ref[...] += jnp.dot(z, w2_ref[...], preferred_element_type=jnp.float32)

    @pl.when(h == pl.num_programs(1) - 1)
    def _():
        o_ref[...] = (acc_ref[...] + b2_ref[...].astype(jnp.float32)).astype(o_ref.dtype)


# ---------------------------------------------------------------------------
# pallas_call builders
# ---------------------------------------------------------------------------
def _run_resident(x2d, w1a, w1g, b1a, b1g, w2, b2_2d, *, tm_eff, grid_m, out_dtype,
                  vmem_limit, cost, single_buffer):
    Mp, dim = x2d.shape
    hidden = w1a.shape[1]

    def wspec(shape, imap):
        # Constant-index weight/bias blocks: one VMEM buffer is enough (never re-fetched).
        if single_buffer:
            return pl.BlockSpec(shape, imap, pipeline_mode=pl.Buffered(1))
        return pl.BlockSpec(shape, imap)

    return pl.pallas_call(
        _ffn_kernel_resident,
        out_shape=jax.ShapeDtypeStruct((Mp, dim), out_dtype),
        grid_spec=pltpu.PrefetchScalarGridSpec(
            num_scalar_prefetch=0,
            grid=(grid_m,),
            in_specs=[
                pl.BlockSpec((tm_eff, dim), lambda i: (i, 0)),      # x tile
                wspec((dim, hidden), lambda i: (0, 0)),             # w1 value half (resident)
                wspec((dim, hidden), lambda i: (0, 0)),             # w1 gate  half (resident)
                wspec((1, hidden), lambda i: (0, 0)),               # b1 value half
                wspec((1, hidden), lambda i: (0, 0)),               # b1 gate  half
                wspec((hidden, dim), lambda i: (0, 0)),             # w2 (resident)
                wspec((1, dim), lambda i: (0, 0)),                  # b2
            ],
            out_specs=pl.BlockSpec((tm_eff, dim), lambda i: (i, 0)),
        ),
        compiler_params=pltpu.CompilerParams(
            dimension_semantics=("parallel",),
            vmem_limit_bytes=vmem_limit,
        ),
        cost_estimate=cost,
    )(x2d, w1a, w1g, b1a, b1g, w2, b2_2d)


def _run_tiled(x2d, w1a, w1g, b1a, b1g, w2, b2_2d, *, tm_eff, th_eff, grid_m, out_dtype,
               vmem_limit, cost):
    Mp, dim = x2d.shape
    Hp = w1a.shape[1]
    grid_h = Hp // th_eff

    return pl.pallas_call(
        _ffn_kernel_tiled,
        out_shape=jax.ShapeDtypeStruct((Mp, dim), out_dtype),
        grid_spec=pltpu.PrefetchScalarGridSpec(
            num_scalar_prefetch=0,
            grid=(grid_m, grid_h),
            in_specs=[
                pl.BlockSpec((tm_eff, dim), lambda i, h: (i, 0)),   # x tile (constant in h)
                pl.BlockSpec((dim, th_eff), lambda i, h: (0, h)),   # w1 value slab
                pl.BlockSpec((dim, th_eff), lambda i, h: (0, h)),   # w1 gate  slab
                pl.BlockSpec((1, th_eff), lambda i, h: (0, h)),     # b1 value slab
                pl.BlockSpec((1, th_eff), lambda i, h: (0, h)),     # b1 gate  slab
                pl.BlockSpec((th_eff, dim), lambda i, h: (h, 0)),   # w2 slab
                pl.BlockSpec((1, dim), lambda i, h: (0, 0)),        # b2
            ],
            out_specs=pl.BlockSpec((tm_eff, dim), lambda i, h: (i, 0)),
            scratch_shapes=[pltpu.VMEM((tm_eff, dim), jnp.float32)],
        ),
        compiler_params=pltpu.CompilerParams(
            dimension_semantics=("parallel", "arbitrary"),
            vmem_limit_bytes=vmem_limit,
        ),
        cost_estimate=cost,
    )(x2d, w1a, w1g, b1a, b1g, w2, b2_2d)


# ---------------------------------------------------------------------------
# Public wrapper
# ---------------------------------------------------------------------------
def feed_forward_pallas(x, w1, b1, w2, b2, *, tm=512, compute_dtype=None,
                        vmem_limit_bytes=None):
    """x: [B, S, dim]; w1: [dim, 2*hidden]; b1: [2*hidden]; w2: [hidden, dim]; b2: [dim].

    tm: token tile (multiple of 128; sweep {256, 512} on v6e/v7x).
    compute_dtype: optional (e.g. jnp.bfloat16) cast of operands before the MXU; accumulation
                   stays f32 and the output keeps x's original dtype.
    """
    B, S, dim = x.shape
    hidden = w2.shape[0]
    assert w1.shape == (dim, 2 * hidden)
    assert b1.shape == (2 * hidden,)
    assert w2.shape == (hidden, dim)
    assert b2.shape == (dim,)

    out_dtype = x.dtype
    if compute_dtype is not None:
        x = x.astype(compute_dtype)
        w1 = w1.astype(compute_dtype)
        b1 = b1.astype(compute_dtype)
        w2 = w2.astype(compute_dtype)
        b2 = b2.astype(compute_dtype)

    M = B * S
    Mp = _round_up(M, 128)                        # alignment only; last token tile may be ragged
    tm_req = max(128, _round_up(int(tm), 128))
    tm_eff = min(tm_req, Mp)
    grid_m = pl.cdiv(Mp, tm_eff)

    x2d = x.reshape(M, dim)
    if Mp != M:
        x2d = jnp.pad(x2d, ((0, Mp - M), (0, 0)))

    # Split first-layer weights/bias into the two GEGLU halves (value / gate).
    w1a = w1[:, :hidden]
    w1g = w1[:, hidden:]
    b1a = b1[:hidden].reshape(1, hidden)
    b1g = b1[hidden:].reshape(1, hidden)
    b2_2d = b2.reshape(1, dim)

    x_item = x2d.dtype.itemsize
    w_item = w1.dtype.itemsize
    o_item = jnp.dtype(out_dtype).itemsize

    vmem_cap = _vmem_capacity_bytes()
    vmem_limit = int(vmem_limit_bytes) if vmem_limit_bytes is not None else int(vmem_cap * 0.8)
    decision_budget = int(vmem_limit * 0.9)

    resident_est = _resident_vmem_estimate(tm_eff, dim, hidden, x_item, w_item, o_item,
                                           single_buffer=_HAS_BUFFERED)
    use_tiled = resident_est > decision_budget

    # Advisory cost estimate for XLA scheduling around the custom call.
    flops = 2 * Mp * dim * (2 * hidden) + 2 * Mp * hidden * dim
    weight_bytes = (w1.size + b1.size + w2.size + b2.size) * w_item
    io_bytes = Mp * dim * (x_item + o_item)
    bytes_accessed = io_bytes + weight_bytes * (grid_m if use_tiled else 1)
    cost = pl.CostEstimate(flops=int(flops), transcendentals=int(Mp * hidden),
                           bytes_accessed=int(bytes_accessed))

    if use_tiled:
        # Pick the largest hidden tile that fits the budget; zero-pad hidden so it divides.
        # Zero padding is exact: padded hidden units produce a==0 and gelu(0)==0, hence z==0.
        th_eff = 128
        for cand in (4096, 2048, 1024, 512, 256, 128):
            if cand > _round_up(hidden, 128):
                continue
            if _tiled_vmem_estimate(tm_eff, dim, cand, x_item, w_item, o_item) <= decision_budget:
                th_eff = cand
                break
        Hp = _round_up(hidden, th_eff)
        if Hp != hidden:
            w1a = jnp.pad(w1a, ((0, 0), (0, Hp - hidden)))
            w1g = jnp.pad(w1g, ((0, 0), (0, Hp - hidden)))
            b1a = jnp.pad(b1a, ((0, 0), (0, Hp - hidden)))
            b1g = jnp.pad(b1g, ((0, 0), (0, Hp - hidden)))
            w2p = jnp.pad(w2, ((0, Hp - hidden), (0, 0)))
        else:
            w2p = w2
        out2d = _run_tiled(x2d, w1a, w1g, b1a, b1g, w2p, b2_2d,
                           tm_eff=tm_eff, th_eff=th_eff, grid_m=grid_m,
                           out_dtype=out_dtype, vmem_limit=vmem_limit, cost=cost)
    else:
        if _HAS_BUFFERED:
            try:
                out2d = _run_resident(x2d, w1a, w1g, b1a, b1g, w2, b2_2d,
                                      tm_eff=tm_eff, grid_m=grid_m, out_dtype=out_dtype,
                                      vmem_limit=vmem_limit, cost=cost, single_buffer=True)
            except Exception:
                # Fallback if single-buffered pipeline_mode is unsupported in this jax build.
                out2d = _run_resident(x2d, w1a, w1g, b1a, b1g, w2, b2_2d,
                                      tm_eff=tm_eff, grid_m=grid_m, out_dtype=out_dtype,
                                      vmem_limit=vmem_limit, cost=cost, single_buffer=False)
        else:
            out2d = _run_resident(x2d, w1a, w1g, b1a, b1g, w2, b2_2d,
                                  tm_eff=tm_eff, grid_m=grid_m, out_dtype=out_dtype,
                                  vmem_limit=vmem_limit, cost=cost, single_buffer=False)

    if Mp != M:
        out2d = out2d[:M]
    return out2d.reshape(B, S, dim)


def feed_forward_ref(x, w1, b1, w2, b2):
    """Pure-JAX reference matching the PyTorch module semantics (eval mode)."""
    h = jnp.einsum("bsd,df->bsf", x, w1) + b1
    hidden = w2.shape[0]
    a, g = h[..., :hidden], h[..., hidden:]
    z = a * (0.5 * g * (1.0 + lax.erf(g / math.sqrt(2.0))))
    return jnp.einsum("bsh,hd->bsd", z, w2) + b2


if __name__ == "__main__":
    batch, seq, dim, mult = 2, 8, 32, 4
    hidden = dim * mult  # 128

    key = jax.random.PRNGKey(0)
    k_x, k_w1, k_b1, k_w2, k_b2 = jax.random.split(key, 5)

    x = jax.random.normal(k_x, (batch, seq, dim), dtype=jnp.float32)

    # Deterministic synthetic params (PyTorch Linear stores weight [out,in]; here [in,out]).
    bound1 = 1.0 / math.sqrt(dim)
    w1 = jax.random.uniform(k_w1, (dim, 2 * hidden), minval=-bound1, maxval=bound1,
                            dtype=jnp.float32)
    b1 = jax.random.uniform(k_b1, (2 * hidden,), minval=-bound1, maxval=bound1,
                            dtype=jnp.float32)

    bound2 = 1.0 / math.sqrt(hidden)
    w2 = jax.random.uniform(k_w2, (hidden, dim), minval=-bound2, maxval=bound2,
                            dtype=jnp.float32)
    b2 = jax.random.uniform(k_b2, (dim,), minval=-bound2, maxval=bound2, dtype=jnp.float32)

    out = feed_forward_pallas(x, w1, b1, w2, b2)
    jax.block_until_ready(out)

    ref = feed_forward_ref(x, w1, b1, w2, b2)
    assert out.shape == (batch, seq, dim)
    # Loose tolerance: both kernel and reference use default (bf16-pass) MXU precision for
    # f32 operands on TPU, so bit-for-bit agreement is not expected.
    assert jnp.allclose(out, ref, atol=2e-2, rtol=2e-2), "mismatch vs reference"

    print("KERNEL_OK")
</pallas_src>

<mosaic_0001>
module attributes {stable_mosaic.version = 11 : i64} {
  func.func @_ffn_kernel_resident(%arg0: i32, %arg1: memref<128x32xf32, #tpu.memory_space<vmem>>, %arg2: memref<32x128xf32, #tpu.memory_space<vmem>>, %arg3: memref<32x128xf32, #tpu.memory_space<vmem>>, %arg4: memref<1x128xf32, #tpu.memory_space<vmem>>, %arg5: memref<1x128xf32, #tpu.memory_space<vmem>>, %arg6: memref<128x32xf32, #tpu.memory_space<vmem>>, %arg7: memref<1x32xf32, #tpu.memory_space<vmem>>, %arg8: memref<128x32xf32, #tpu.memory_space<vmem>>) attributes {dimension_semantics = [#tpu.dimension_semantics<parallel>], iteration_bounds = array<i64: 1>, scalar_prefetch = 0 : i64, scratch_operands = 0 : i64, tpu.core_type = #tpu.core_type<tc>, window_params = [{transform_indices = @transform_0, window_bounds = array<i64: 128, 32>}, {pipeline_mode = #tpu.pipeline_mode<synchronous>, transform_indices = @transform_1, window_bounds = array<i64: 32, 128>}, {pipeline_mode = #tpu.pipeline_mode<synchronous>, transform_indices = @transform_2, window_bounds = array<i64: 32, 128>}, {pipeline_mode = #tpu.pipeline_mode<synchronous>, transform_indices = @transform_3, window_bounds = array<i64: 1, 128>}, {pipeline_mode = #tpu.pipeline_mode<synchronous>, transform_indices = @transform_4, window_bounds = array<i64: 1, 128>}, {pipeline_mode = #tpu.pipeline_mode<synchronous>, transform_indices = @transform_5, window_bounds = array<i64: 128, 32>}, {pipeline_mode = #tpu.pipeline_mode<synchronous>, transform_indices = @transform_6, window_bounds = array<i64: 1, 32>}, {transform_indices = @transform_7, window_bounds = array<i64: 128, 32>}]} {
    %c0 = arith.constant 0 : index
    %c0_0 = arith.constant 0 : index
    %0 = vector.load %arg1[%c0, %c0_0] : memref<128x32xf32, #tpu.memory_space<vmem>>, vector<128x32xf32>
    %c0_1 = arith.constant 0 : index
    %c0_2 = arith.constant 0 : index
    %1 = vector.load %arg2[%c0_1, %c0_2] : memref<32x128xf32, #tpu.memory_space<vmem>>, vector<32x128xf32>
    %cst = arith.constant dense<0.000000e+00> : vector<128x128xf32>
    %2 = tpu.matmul %0, %1, %cst {dimension_numbers = #tpu.dot_dimension_numbers<[1], [0], [0], [1], [0, 0, 1, 1], [], []>} : vector<128x32xf32>, vector<32x128xf32>, vector<128x128xf32> -> vector<128x128xf32>
    %c0_3 = arith.constant 0 : index
    %c0_4 = arith.constant 0 : index
    %3 = vector.load %arg4[%c0_3, %c0_4] : memref<1x128xf32, #tpu.memory_space<vmem>>, vector<1x128xf32>
    %4 = vector.broadcast %3 : vector<1x128xf32> to vector<128x128xf32>
    %5 = arith.addf %2, %4 : vector<128x128xf32>
    %c0_5 = arith.constant 0 : index
    %c0_6 = arith.constant 0 : index
    %6 = vector.load %arg3[%c0_5, %c0_6] : memref<32x128xf32, #tpu.memory_space<vmem>>, vector<32x128xf32>
    %cst_7 = arith.constant dense<0.000000e+00> : vector<128x128xf32>
    %7 = tpu.matmul %0, %6, %cst_7 {dimension_numbers = #tpu.dot_dimension_numbers<[1], [0], [0], [1], [0, 0, 1, 1], [], []>} : vector<128x32xf32>, vector<32x128xf32>, vector<128x128xf32> -> vector<128x128xf32>
    %c0_8 = arith.constant 0 : index
    %c0_9 = arith.constant 0 : index
    %8 = vector.load %arg5[%c0_8, %c0_9] : memref<1x128xf32, #tpu.memory_space<vmem>>, vector<1x128xf32>
    %9 = vector.broadcast %8 : vector<1x128xf32> to vector<128x128xf32>
    %10 = arith.addf %7, %9 : vector<128x128xf32>
    %cst_10 = arith.constant 5.000000e-01 : f32
    %11 = vector.broadcast %cst_10 : f32 to vector<128x128xf32>
    %12 = arith.mulf %11, %10 : vector<128x128xf32>
    %cst_11 = arith.constant 0.707106769 : f32
    %13 = vector.broadcast %cst_11 : f32 to vector<128x128xf32>
    %14 = arith.mulf %10, %13 : vector<128x128xf32>
    %15 = math.erf %14 : vector<128x128xf32>
    %cst_12 = arith.constant 1.000000e+00 : f32
    %16 = vector.broadcast %cst_12 : f32 to vector<128x128xf32>
    %17 = arith.addf %16, %15 : vector<128x128xf32>
    %18 = arith.mulf %12, %17 : vector<128x128xf32>
    %19 = arith.mulf %5, %18 : vector<128x128xf32>
    %c0_13 = arith.constant 0 : index
    %c0_14 = arith.constant 0 : index
    %20 = vector.load %arg6[%c0_13, %c0_14] : memref<128x32xf32, #tpu.memory_space<vmem>>, vector<128x32xf32>
    %cst_15 = arith.constant dense<0.000000e+00> : vector<128x32xf32>
    %21 = tpu.matmul %19, %20, %cst_15 {dimension_numbers = #tpu.dot_dimension_numbers<[1], [0], [0], [1], [0, 0, 1, 1], [], []>} : vector<128x128xf32>, vector<128x32xf32>, vector<128x32xf32> -> vector<128x32xf32>
    %c0_16 = arith.constant 0 : index
    %c0_17 = arith.constant 0 : index
    %22 = vector.load %arg7[%c0_16, %c0_17] : memref<1x32xf32, #tpu.memory_space<vmem>>, vector<1x32xf32>
    %23 = vector.broadcast %22 : vector<1x32xf32> to vector<128x32xf32>
    %24 = arith.addf %21, %23 : vector<128x32xf32>
    %c0_18 = arith.constant 0 : index
    %c0_19 = arith.constant 0 : index
    %25 = vector.load %arg8[%c0_18, %c0_19] : memref<128x32xf32, #tpu.memory_space<vmem>>, vector<128x32xf32>
    tpu.vector_store %arg8[%c0_18, %c0_19], %24 {strides = array<i32>} : memref<128x32xf32, #tpu.memory_space<vmem>>, vector<128x32xf32>,
    return
  }
  func.func @transform_0(%arg0: i32) -> (i32, i32) {
    %c0_i32 = arith.constant 0 : i32
    %c0_i32_0 = arith.constant 0 : i32
    return %arg0, %c0_i32 : i32, i32
  }
  func.func @transform_1(%arg0: i32) -> (i32, i32) {
    %c0_i32 = arith.constant 0 : i32
    %c0_i32_0 = arith.constant 0 : i32
    %c0_i32_1 = arith.constant 0 : i32
    return %c0_i32, %c0_i32_0 : i32, i32
  }
  func.func @transform_2(%arg0: i32) -> (i32, i32) {
    %c0_i32 = arith.constant 0 : i32
    %c0_i32_0 = arith.constant 0 : i32
    %c0_i32_1 = arith.constant 0 : i32
    return %c0_i32, %c0_i32_0 : i32, i32
  }
  func.func @transform_3(%arg0: i32) -> (i32, i32) {
    %c0_i32 = arith.constant 0 : i32
    %c0_i32_0 = arith.constant 0 : i32
    %c0_i32_1 = arith.constant 0 : i32
    return %c0_i32, %c0_i32_0 : i32, i32
  }
  func.func @transform_4(%arg0: i32) -> (i32, i32) {
    %c0_i32 = arith.constant 0 : i32
    %c0_i32_0 = arith.constant 0 : i32
    %c0_i32_1 = arith.constant 0 : i32
    return %c0_i32, %c0_i32_0 : i32, i32
  }
  func.func @transform_5(%arg0: i32) -> (i32, i32) {
    %c0_i32 = arith.constant 0 : i32
    %c0_i32_0 = arith.constant 0 : i32
    %c0_i32_1 = arith.constant 0 : i32
    return %c0_i32, %c0_i32_0 : i32, i32
  }
  func.func @transform_6(%arg0: i32) -> (i32, i32) {
    %c0_i32 = arith.constant 0 : i32
    %c0_i32_0 = arith.constant 0 : i32
    %c0_i32_1 = arith.constant 0 : i32
    return %c0_i32, %c0_i32_0 : i32, i32
  }
  func.func @transform_7(%arg0: i32) -> (i32, i32) {
    %c0_i32 = arith.constant 0 : i32
    %c0_i32_0 = arith.constant 0 : i32
    return %arg0, %c0_i32 : i32, i32
  }
}

module attributes {stable_mosaic.version = 11 : i64} {
  func.func @_ffn_kernel_resident(%arg0: i32, %arg1: memref<128x32xf32, #tpu.memory_space<vmem>>, %arg2: memref<32x128xf32, #tpu.memory_space<vmem>>, %arg3: memref<32x128xf32, #tpu.memory_space<vmem>>, %arg4: memref<1x128xf32, #tpu.memory_space<vmem>>, %arg5: memref<1x128xf32, #tpu.memory_space<vmem>>, %arg6: memref<128x32xf32, #tpu.memory_space<vmem>>, %arg7: memref<1x32xf32, #tpu.memory_space<vmem>>, %arg8: memref<128x32xf32, #tpu.memory_space<vmem>>) attributes {dimension_semantics = [#tpu.dimension_semantics<parallel>], iteration_bounds = array<i64: 1>, scalar_prefetch = 0 : i64, scratch_operands = 0 : i64, tpu.core_type = #tpu.core_type<tc>, window_params = [{transform_indices = @transform_0, window_bounds = array<i64: 128, 32>}, {pipeline_mode = #tpu.pipeline_mode<synchronous>, transform_indices = @transform_1, window_bounds = array<i64: 32, 128>}, {pipeline_mode = #tpu.pipeline_mode<synchronous>, transform_indices = @transform_2, window_bounds = array<i64: 32, 128>}, {pipeline_mode = #tpu.pipeline_mode<synchronous>, transform_indices = @transform_3, window_bounds = array<i64: 1, 128>}, {pipeline_mode = #tpu.pipeline_mode<synchronous>, transform_indices = @transform_4, window_bounds = array<i64: 1, 128>}, {pipeline_mode = #tpu.pipeline_mode<synchronous>, transform_indices = @transform_5, window_bounds = array<i64: 128, 32>}, {pipeline_mode = #tpu.pipeline_mode<synchronous>, transform_indices = @transform_6, window_bounds = array<i64: 1, 32>}, {transform_indices = @transform_7, window_bounds = array<i64: 128, 32>}]} {
    %c0 = arith.constant 0 : index
    %c0_0 = arith.constant 0 : index
    %0 = vector.load %arg1[%c0, %c0_0] : memref<128x32xf32, #tpu.memory_space<vmem>>, vector<128x32xf32>
    %c0_1 = arith.constant 0 : index
    %c0_2 = arith.constant 0 : index
    %1 = vector.load %arg2[%c0_1, %c0_2] : memref<32x128xf32, #tpu.memory_space<vmem>>, vector<32x128xf32>
    %cst = arith.constant dense<0.000000e+00> : vector<128x128xf32>
    %2 = tpu.matmul %0, %1, %cst {dimension_numbers = #tpu.dot_dimension_numbers<[1], [0], [0], [1], [0, 0, 1, 1], [], []>} : vector<128x32xf32>, vector<32x128xf32>, vector<128x128xf32> -> vector<128x128xf32>
    %c0_3 = arith.constant 0 : index
    %c0_4 = arith.constant 0 : index
    %3 = vector.load %arg4[%c0_3, %c0_4] : memref<1x128xf32, #tpu.memory_space<vmem>>, vector<1x128xf32>
    %4 = vector.broadcast %3 : vector<1x128xf32> to vector<128x128xf32>
    %5 = arith.addf %2, %4 : vector<128x128xf32>
    %c0_5 = arith.constant 0 : index
    %c0_6 = arith.constant 0 : index
    %6 = vector.load %arg3[%c0_5, %c0_6] : memref<32x128xf32, #tpu.memory_space<vmem>>, vector<32x128xf32>
    %cst_7 = arith.constant dense<0.000000e+00> : vector<128x128xf32>
    %7 = tpu.matmul %0, %6, %cst_7 {dimension_numbers = #tpu.dot_dimension_numbers<[1], [0], [0], [1], [0, 0, 1, 1], [], []>} : vector<128x32xf32>, vector<32x128xf32>, vector<128x128xf32> -> vector<128x128xf32>
    %c0_8 = arith.constant 0 : index
    %c0_9 = arith.constant 0 : index
    %8 = vector.load %arg5[%c0_8, %c0_9] : memref<1x128xf32, #tpu.memory_space<vmem>>, vector<1x128xf32>
    %9 = vector.broadcast %8 : vector<1x128xf32> to vector<128x128xf32>
    %10 = arith.addf %7, %9 : vector<128x128xf32>
    %cst_10 = arith.constant 5.000000e-01 : f32
    %11 = vector.broadcast %cst_10 : f32 to vector<128x128xf32>
    %12 = arith.mulf %11, %10 : vector<128x128xf32>
    %cst_11 = arith.constant 0.707106769 : f32
    %13 = vector.broadcast %cst_11 : f32 to vector<128x128xf32>
    %14 = arith.mulf %10, %13 : vector<128x128xf32>
    %15 = math.erf %14 : vector<128x128xf32>
    %cst_12 = arith.constant 1.000000e+00 : f32
    %16 = vector.broadcast %cst_12 : f32 to vector<128x128xf32>
    %17 = arith.addf %16, %15 : vector<128x128xf32>
    %18 = arith.mulf %12, %17 : vector<128x128xf32>
    %19 = arith.mulf %5, %18 : vector<128x128xf32>
    %c0_13 = arith.constant 0 : index
    %c0_14 = arith.constant 0 : index
    %20 = vector.load %arg6[%c0_13, %c0_14] : memref<128x32xf32, #tpu.memory_space<vmem>>, vector<128x32xf32>
    %cst_15 = arith.constant dense<0.000000e+00> : vector<128x32xf32>
    %21 = tpu.matmul %19, %20, %cst_15 {dimension_numbers = #tpu.dot_dimension_numbers<[1], [0], [0], [1], [0, 0, 1, 1], [], []>} : vector<128x128xf32>, vector<128x32xf32>, vector<128x32xf32> -> vector<128x32xf32>
    %c0_16 = arith.constant 0 : index
    %c0_17 = arith.constant 0 : index
    %22 = vector.load %arg7[%c0_16, %c0_17] : memref<1x32xf32, #tpu.memory_space<vmem>>, vector<1x32xf32>
    %23 = vector.broadcast %22 : vector<1x32xf32> to vector<128x32xf32>
    %24 = arith.addf %21, %23 : vector<128x32xf32>
    %c0_18 = arith.constant 0 : index
    %c0_19 = arith.constant 0 : index
    %25 = vector.load %arg8[%c0_18, %c0_19] : memref<128x32xf32, #tpu.memory_space<vmem>>, vector<128x32xf32>
    tpu.vector_store %arg8[%c0_18, %c0_19], %24 {strides = array<i32>} : memref<128x32xf32, #tpu.memory_space<vmem>>, vector<128x32xf32>,
    return
  }
  func.func @transform_0(%arg0: i32) -> (i32, i32) {
    %c0_i32 = arith.constant 0 : i32
    %c0_i32_0 = arith.constant 0 : i32
    return %arg0, %c0_i32 : i32, i32
  }
  func.func @transform_1(%arg0: i32) -> (i32, i32) {
    %c0_i32 = arith.constant 0 : i32
    %c0_i32_0 = arith.constant 0 : i32
    %c0_i32_1 = arith.constant 0 : i32
    return %c0_i32, %c0_i32_0 : i32, i32
  }
  func.func @transform_2(%arg0: i32) -> (i32, i32) {
    %c0_i32 = arith.constant 0 : i32
    %c0_i32_0 = arith.constant 0 : i32
    %c0_i32_1 = arith.constant 0 : i32
    return %c0_i32, %c0_i32_0 : i32, i32
  }
  func.func @transform_3(%arg0: i32) -> (i32, i32) {
    %c0_i32 = arith.constant 0 : i32
    %c0_i32_0 = arith.constant 0 : i32
    %c0_i32_1 = arith.constant 0 : i32
    return %c0_i32, %c0_i32_0 : i32, i32
  }
  func.func @transform_4(%arg0: i32) -> (i32, i32) {
    %c0_i32 = arith.constant 0 : i32
    %c0_i32_0 = arith.constant 0 : i32
    %c0_i32_1 = arith.constant 0 : i32
    return %c0_i32, %c0_i32_0 : i32, i32
  }
  func.func @transform_5(%arg0: i32) -> (i32, i32) {
    %c0_i32 = arith.constant 0 : i32
    %c0_i32_0 = arith.constant 0 : i32
    %c0_i32_1 = arith.constant 0 : i32
    return %c0_i32, %c0_i32_0 : i32, i32
  }
  func.func @transform_6(%arg0: i32) -> (i32, i32) {
    %c0_i32 = arith.constant 0 : i32
    %c0_i32_0 = arith.constant 0 : i32
    %c0_i32_1 = arith.constant 0 : i32
    return %c0_i32, %c0_i32_0 : i32, i32
  }
  func.func @transform_7(%arg0: i32) -> (i32, i32) {
    %c0_i32 = arith.constant 0 : i32
    %c0_i32_0 = arith.constant 0 : i32
    return %arg0, %c0_i32 : i32, i32
  }
}

</mosaic_0001>

<bundles_post_ra>
// kernel: tpu_custom_call.1
= control target key start
LH: loop header
LB: loop body
LE: loop exit
PB: predicated region body
PF: predicated region fallthrough
CT: control target
= control target key end

     0   :  { %vm53_vm0 = vcmask 261120   ;;  %s1351_s2 = inlined_call_operand.vmem [shape: f32[32,128], index: 2, kind: input, shape index: {}]   ;;  %s1352_s0 = inlined_call_operand.vmem [shape: f32[128,32], index: 0, kind: input, shape index: {}]   ;;  %s1353_s1 = inlined_call_operand.vmem [shape: f32[32,128], index: 1, kind: input, shape index: {}]   ;;  %s1354_s5 = inlined_call_operand.vmem [shape: f32[128,32], index: 5, kind: input, shape index: {}]   ;;  %s1355_s4 = inlined_call_operand.vmem [shape: f32[1,128], index: 4, kind: input, shape index: {}]   ;;  %s1356_s3 = inlined_call_operand.vmem [shape: f32[1,128], index: 3, kind: input, shape index: {}]   ;;  %s1357_s6 = inlined_call_operand.vmem [shape: f32[1,32], index: 6, kind: input, shape index: {}]   ;;  %s1358_s7 = inlined_call_operand.vmem [shape: f32[128,32], index: 7, kind: output, shape index: {}]  }
   0x1   :  { %v250_v0 = vld [vmem:[%s1351_s2 + $0x18] sm:$0xff]  ;;  %v249_v1 = vld [vmem:[%s1351_s2 + $0x10] sm:$0xff]  ;;  %v26_v2 = vld [vmem:[%s1352_s0] sm:$0xff] }
   0x2   :  { %826 = vmatprep.subr.mxu1 %v250_v0  ;;  %v248_v3 = vld [vmem:[%s1351_s2 + $0x8] sm:$0xff]  ;;  %834 = vmatprep.mubr.msk.f32.mxu1 %vm53_vm0, %v26_v2  ;;  %v45_v4 = vld [vmem:[%s1353_s1 + $0x18] sm:$0xff]  ;;  %v247_v5 = vld [vmem:[%s1351_s2] sm:$0xff] }
   0x3   :  { %827 = vmatpush3.msra.mxu1 %v250_v0  ;;  %802 = vmatprep.mubr.msk.f32.mxu0 %vm53_vm0, %v26_v2  ;;  %v44_v6 = vld [vmem:[%s1353_s1 + $0x10] sm:$0xff]  ;;  %v43_v7 = vld [vmem:[%s1353_s1 + $0x8] sm:$0xff]  ;;  %v42_v10 = vld [vmem:[%s1353_s1] sm:$0xff] }
   0x4   :  { %828 = vmatprep.subr.mxu1 %v249_v1  ;;  %794 = vmatprep.subr.mxu0 %v45_v4  ;;  %v27_v8 = vld [vmem:[%s1352_s0 + $0x8] sm:$0xff]  ;;  %v28_v9 = vld [vmem:[%s1352_s0 + $0x10] sm:$0xff]  ;;  %v514_v11 = vld [vmem:[%s1354_s5 + $0x78] sm:$0xff] }
   0x5   :  { %829 = vmatpush3.msra.mxu1 %v249_v1  ;;  %795 = vmatpush3.msra.mxu0 %v45_v4  ;;  %v29_v12 = vld [vmem:[%s1352_s0 + $0x18] sm:$0xff]  ;;  %v30_v13 = vld [vmem:[%s1352_s0 + $0x20] sm:$0xff]  ;;  %v513_v14 = vld [vmem:[%s1354_s5 + $0x70] sm:$0xff] }
   0x6   :  { %830 = vmatprep.subr.mxu1 %v248_v3  ;;  %796 = vmatprep.subr.mxu0 %v44_v6  ;;  %v31_v15 = vld [vmem:[%s1352_s0 + $0x28] sm:$0xff]  ;;  %v32_v16 = vld [vmem:[%s1352_s0 + $0x30] sm:$0xff]  ;;  %v33_v17 = vld [vmem:[%s1352_s0 + $0x38] sm:$0xff] }
   0x7   :  { %831 = vmatpush3.msra.mxu1 %v248_v3  ;;  %797 = vmatpush3.msra.mxu0 %v44_v6  ;;  %v34_v18 = vld [vmem:[%s1352_s0 + $0x40] sm:$0xff]  ;;  %v35_v19 = vld [vmem:[%s1352_s0 + $0x48] sm:$0xff]  ;;  %v36_v20 = vld [vmem:[%s1352_s0 + $0x50] sm:$0xff] }
   0x8   :  { %832 = vmatprep.subr.mxu1 %v247_v5  ;;  %798 = vmatprep.subr.mxu0 %v43_v7  ;;  %v37_v21 = vld [vmem:[%s1352_s0 + $0x58] sm:$0xff]  ;;  %v38_v22 = vld [vmem:[%s1352_s0 + $0x60] sm:$0xff]  ;;  %v39_v23 = vld [vmem:[%s1352_s0 + $0x68] sm:$0xff] }
   0x9   :  { %833 = vmatpush3.msra.mxu1 %v247_v5  ;;  %799 = vmatpush3.msra.mxu0 %v43_v7  ;;  %v40_v24 = vld [vmem:[%s1352_s0 + $0x70] sm:$0xff]  ;;  %v41_v25 = vld [vmem:[%s1352_s0 + $0x78] sm:$0xff]  ;;  %v512_v26 = vld [vmem:[%s1354_s5 + $0x68] sm:$0xff] }
   0xa   :  { %835 = vmatmul.mubr.msk.f32.vlgmr.msra.gmra.mxu1 %vm53_vm0, %v27_v8  ;;  %800 = vmatprep.subr.mxu0 %v42_v10  ;;  %v511_v27 = vld [vmem:[%s1354_s5 + $0x60] sm:$0xff]  ;;  %v510_v28 = vld [vmem:[%s1354_s5 + $0x58] sm:$0xff]  ;;  %v509_v29 = vld [vmem:[%s1354_s5 + $0x50] sm:$0xff] }
   0xb   :  { %837 = vmatprep.mubr.msk.f32.mxu1 %vm53_vm0, %v28_v9  ;;  %801 = vmatpush3.msra.mxu0 %v42_v10  ;;  %v508_v30 = vld [vmem:[%s1354_s5 + $0x48] sm:$0xff]  ;;  %v507_v31 = vld [vmem:[%s1354_s5 + $0x40] sm:$0xff]  ;;  %v506_v32 = vld [vmem:[%s1354_s5 + $0x38] sm:$0xff] }
   0xc   :  { %914 = vmatprep.subr.mxu1 %v514_v11  ;;  %803 = vmatmul.mubr.msk.f32.vlgmr.msra.gmra.mxu0 %vm53_vm0, %v27_v8  ;;  %v505_v33 = vld [vmem:[%s1354_s5 + $0x30] sm:$0xff]  ;;  %v504_v34 = vld [vmem:[%s1354_s5 + $0x28] sm:$0xff]  ;;  %v503_v35 = vld [vmem:[%s1354_s5 + $0x20] sm:$0xff] }
   0xd   :  { %858 = vmatprep.subr.mxu0 %v514_v11  ;;  %805 = vmatprep.mubr.msk.f32.mxu0 %vm53_vm0, %v28_v9  ;;  %v502_v36 = vld [vmem:[%s1354_s5 + $0x18] sm:$0xff]  ;;  %v501_v37 = vld [vmem:[%s1354_s5 + $0x10] sm:$0xff]  ;;  %v500_v38 = vld [vmem:[%s1354_s5 + $0x8] sm:$0xff] }
   0xe   :  { %838 = vmatmul.mubr.msk.f32.gmra.mxu1 %vm53_vm0, %v29_v12  ;;  %859 = vmatpush3.msra.mxu0 %v514_v11  ;;  %v499_v39 = vld [vmem:[%s1354_s5] sm:$0xff] }
   0xf   :  { %840 = vmatprep.mubr.msk.f32.mxu1 %vm53_vm0, %v30_v13  ;;  %860 = vmatprep.subr.mxu0 %v513_v14  ;;  %v1173_v40 = vld [vmem:[%s1355_s4] ss:$0 sm:$0xff] }
  0x10   :  { %930 = vmatpush3.msra.mxu1 %v514_v11  ;;  %806 = vmatmul.mubr.msk.f32.gmra.mxu0 %vm53_vm0, %v29_v12 }
  0x11   :  { %915 = vmatprep.subr.mxu1 %v513_v14  ;;  %808 = vmatprep.mubr.msk.f32.mxu0 %vm53_vm0, %v30_v13 }
  0x12   :  { %841 = vmatmul.mubr.msk.f32.gmra.mxu1 %vm53_vm0, %v31_v15  ;;  %861 = vmatpush3.msra.mxu0 %v513_v14 }
  0x13   :  { %843 = vmatprep.mubr.msk.f32.mxu1 %vm53_vm0, %v32_v16  ;;  %931 = vmatpush3.msra.mxu1 %v513_v14  ;;  %v1214_v14 = vld [vmem:[%s1356_s3] ss:$0 sm:$0xff] }
  0x14   :  { %809 = vmatmul.mubr.msk.f32.gmra.mxu0 %vm53_vm0, %v31_v15  ;;  %862 = vmatprep.subr.mxu0 %v512_v26 }
  0x15   :  { %811 = vmatprep.mubr.msk.f32.mxu0 %vm53_vm0, %v32_v16  ;;  %916 = vmatprep.subr.mxu1 %v512_v26 }
  0x16   :  { %844 = vmatmul.mubr.msk.f32.gmra.mxu1 %vm53_vm0, %v33_v17  ;;  %863 = vmatpush3.msra.mxu0 %v512_v26 }
  0x17   :  { %846 = vmatprep.mubr.msk.f32.mxu1 %vm53_vm0, %v34_v18  ;;  %932 = vmatpush3.msra.mxu1 %v512_v26 }
  0x18   :  { %812 = vmatmul.mubr.msk.f32.gmra.mxu0 %vm53_vm0, %v33_v17  ;;  %864 = vmatprep.subr.mxu0 %v511_v27 }
  0x19   :  { %814 = vmatprep.mubr.msk.f32.mxu0 %vm53_vm0, %v34_v18  ;;  %917 = vmatprep.subr.mxu1 %v511_v27 }
  0x1a   :  { %847 = vmatmul.mubr.msk.f32.gmra.mxu1 %vm53_vm0, %v35_v19  ;;  %865 = vmatpush3.msra.mxu0 %v511_v27 }
  0x1b   :  { %849 = vmatprep.mubr.msk.f32.mxu1 %vm53_vm0, %v36_v20  ;;  %933 = vmatpush3.msra.mxu1 %v511_v27 }
  0x1c   :  { %815 = vmatmul.mubr.msk.f32.gmra.mxu0 %vm53_vm0, %v35_v19  ;;  %866 = vmatprep.subr.mxu0 %v510_v28 }
  0x1d   :  { %817 = vmatprep.mubr.msk.f32.mxu0 %vm53_vm0, %v36_v20  ;;  %918 = vmatprep.subr.mxu1 %v510_v28 }
  0x1e   :  { %850 = vmatmul.mubr.msk.f32.gmra.mxu1 %vm53_vm0, %v37_v21  ;;  %867 = vmatpush3.msra.mxu0 %v510_v28 }
  0x1f   :  { %852 = vmatprep.mubr.msk.f32.mxu1 %vm53_vm0, %v38_v22  ;;  %934 = vmatpush3.msra.mxu1 %v510_v28 }
  0x20   :  { %818 = vmatmul.mubr.msk.f32.gmra.mxu0 %vm53_vm0, %v37_v21  ;;  %868 = vmatprep.subr.mxu0 %v509_v29 }
  0x21   :  { %820 = vmatprep.mubr.msk.f32.mxu0 %vm53_vm0, %v38_v22  ;;  %919 = vmatprep.subr.mxu1 %v509_v29 }
  0x22   :  { %853 = vmatmul.mubr.msk.f32.gmra.mxu1 %vm53_vm0, %v39_v23  ;;  %869 = vmatpush3.msra.mxu0 %v509_v29 }
  0x23   :  { %855 = vmatprep.mubr.msk.f32.mxu1 %vm53_vm0, %v40_v24  ;;  %935 = vmatpush3.msra.mxu1 %v509_v29 }
  0x24   :  { %821 = vmatmul.mubr.msk.f32.gmra.mxu0 %vm53_vm0, %v39_v23  ;;  %870 = vmatprep.subr.mxu0 %v508_v30 }
  0x25   :  { %823 = vmatprep.mubr.msk.f32.mxu0 %vm53_vm0, %v40_v24  ;;  %920 = vmatprep.subr.mxu1 %v508_v30 }
  0x26   :  { %856 = vmatmul.mubr.msk.f32.gmra.mxu1 %vm53_vm0, %v41_v25  ;;  %871 = vmatpush3.msra.mxu0 %v508_v30 }
  0x27   :  { %936 = vmatpush3.msra.mxu1 %v508_v30  ;;  %872 = vmatprep.subr.mxu0 %v507_v31 }
  0x28   :  { %824 = vmatmul.mubr.msk.f32.gmra.mxu0 %vm53_vm0, %v41_v25  ;;  %921 = vmatprep.subr.mxu1 %v507_v31 }
  0x29   :  { %873 = vmatpush3.msra.mxu0 %v507_v31  ;;  %937 = vmatpush3.msra.mxu1 %v507_v31 }
  0x2a   :  { %874 = vmatprep.subr.mxu0 %v506_v32  ;;  %922 = vmatprep.subr.mxu1 %v506_v32 }
  0x2b   :  { %875 = vmatpush3.msra.mxu0 %v506_v32  ;;  %938 = vmatpush3.msra.mxu1 %v506_v32 }
  0x2c   :  { %876 = vmatprep.subr.mxu0 %v505_v33  ;;  %923 = vmatprep.subr.mxu1 %v505_v33 }
  0x2d   :  { %877 = vmatpush3.msra.mxu0 %v505_v33  ;;  %939 = vmatpush3.msra.mxu1 %v505_v33 }
  0x2e   :  { %878 = vmatprep.subr.mxu0 %v504_v34  ;;  %924 = vmatprep.subr.mxu1 %v504_v34 }
  0x2f   :  { %879 = vmatpush3.msra.mxu0 %v504_v34  ;;  %940 = vmatpush3.msra.mxu1 %v504_v34 }
  0x30   :  { %880 = vmatprep.subr.mxu0 %v503_v35  ;;  %925 = vmatprep.subr.mxu1 %v503_v35 }
  0x31   :  { %881 = vmatpush3.msra.mxu0 %v503_v35  ;;  %941 = vmatpush3.msra.mxu1 %v503_v35 }
  0x32   :  { %882 = vmatprep.subr.mxu0 %v502_v36  ;;  %926 = vmatprep.subr.mxu1 %v502_v36 }
  0x33   :  { %883 = vmatpush3.msra.mxu0 %v502_v36  ;;  %942 = vmatpush3.msra.mxu1 %v502_v36 }
  0x34   :  { %884 = vmatprep.subr.mxu0 %v501_v37  ;;  %927 = vmatprep.subr.mxu1 %v501_v37 }
  0x35   :  { %885 = vmatpush3.msra.mxu0 %v501_v37  ;;  %943 = vmatpush3.msra.mxu1 %v501_v37 }
  0x36   :  { %886 = vmatprep.subr.mxu0 %v500_v38  ;;  %928 = vmatprep.subr.mxu1 %v500_v38 }
  0x37   :  { %887 = vmatpush3.msra.mxu0 %v500_v38  ;;  %944 = vmatpush3.msra.mxu1 %v500_v38 }
  0x38   :  { %888 = vmatprep.subr.mxu0 %v499_v39  ;;  %929 = vmatprep.subr.mxu1 %v499_v39 }
  0x39   :  { %889 = vmatpush3.msra.mxu0 %v499_v39  ;;  %945 = vmatpush3.msra.mxu1 %v499_v39 }
  0xca   :  { %v836_v41 = vpop.f32.mrf.mxu1 }
  0xcb   :  { %v330_v42 = vadd.f32 %v836_v41, %v1173_v40 }
  0xcc   :  { %v324_v43 = vpop.f32.mrf.mxu1  ;;  %v804_v46 = vpop.f32.mrf.mxu0 }
  0xcd   :  { %v420_v44 = vmul.f32 0.70710677, %v330_v42  ;;  %v325_v45 = vadd.f32 %v1173_v40, %v324_v43  ;;  %v404_v17 = vmul.f32 0.5, %v330_v42  ;;  %v174_v25 = vadd.f32 %v804_v46, %v1214_v14 }
  0xce   :  { %v839_v47 = vpop.f32.mrf.mxu1  ;;  %v168_v50 = vpop.f32.mrf.mxu0 }
  0xcf   :  { %946 = verf.f32 %v420_v44  ;;  %v419_v48 = vmul.f32 0.70710677, %v325_v45  ;;  %v340_v49 = vadd.f32 %v839_v47, %v1173_v40  ;;  %v403_v21 = vmul.f32 0.5, %v325_v45 }
  0xd0   :  { %v334_v51 = vpop.f32.mrf.mxu1  ;;  %v1179_v54 = vpop.f32.mrf.mxu0  ;;  %v169_v30 = vadd.f32 %v1214_v14, %v168_v50 }
  0xd1   :  { %948 = verf.f32 %v419_v48  ;;  %v422_v52 = vmul.f32 0.70710677, %v340_v49  ;;  %v335_v53 = vadd.f32 %v1173_v40, %v334_v51  ;;  %v406_v29 = vmul.f32 0.5, %v340_v49 }
  0xd2   :  { %v842_v55 = vpop.f32.mrf.mxu1  ;;  %v1184_v58 = vpop.f32.mrf.mxu0  ;;  %v184_v45 = vadd.f32 %v1179_v54, %v1214_v14 }
  0xd3   :  { %950 = verf.f32 %v422_v52  ;;  %v421_v56 = vmul.f32 0.70710677, %v335_v53  ;;  %v1182_v57 = vadd.f32 %v842_v55, %v1173_v40  ;;  %v405_v34 = vmul.f32 0.5, %v335_v53 }
  0xd4   :  { %v344_v59 = vpop.f32.mrf.mxu1  ;;  %v1190_v62 = vpop.f32.mrf.mxu0  ;;  %v179_v49 = vadd.f32 %v1214_v14, %v1184_v58 }
  0xd5   :  { %952 = verf.f32 %v421_v56  ;;  %v424_v60 = vmul.f32 0.70710677, %v1182_v57  ;;  %v1188_v61 = vadd.f32 %v1173_v40, %v344_v59  ;;  %v408_v55 = vmul.f32 0.5, %v1182_v57 }
  0xd6   :  { %v845_v63 = vpop.f32.mrf.mxu1  ;;  %v1196_v2 = vpop.f32.mrf.mxu0  ;;  %v194_v56 = vadd.f32 %v1190_v62, %v1214_v14 }
  0xd7   :  { %954 = verf.f32 %v424_v60  ;;  %v423_v0 = vmul.f32 0.70710677, %v1188_v61  ;;  %v1194_v1 = vadd.f32 %v845_v63, %v1173_v40  ;;  %v407_v58 = vmul.f32 0.5, %v1188_v61 }
  0xd8   :  { %v354_v3 = vpop.f32.mrf.mxu1  ;;  %v1202_v6 = vpop.f32.mrf.mxu0 }
  0xd9   :  { %956 = verf.f32 %v423_v0  ;;  %v426_v4 = vmul.f32 0.70710677, %v1194_v1  ;;  %v1200_v5 = vadd.f32 %v1173_v40, %v354_v3 }
  0xda   :  { %v848_v7 = vpop.f32.mrf.mxu1  ;;  %v1208_v10 = vpop.f32.mrf.mxu0 }
  0xdb   :  { %958 = verf.f32 %v426_v4  ;;  %v425_v8 = vmul.f32 0.70710677, %v1200_v5  ;;  %v1206_v9 = vadd.f32 %v848_v7, %v1173_v40 }
  0xdc   :  { %v947_v11 = vpop.eup %946  ;;  %v364_v12 = vpop.f32.mrf.mxu1 }
  0xdd   :  { %960 = verf.f32 %v425_v8  ;;  %v428_v13 = vmul.f32 0.70710677, %v1206_v9  ;;  %v452_v15 = vadd.f32 1.0, %v947_v11  ;;  %v1217_v18 = vadd.f32 %v1173_v40, %v364_v12  ;;  %v1219_v20 = vpop.f32.mrf.mxu0 }
  0xde   :  { %v949_v16 = vpop.eup %948  ;;  %v851_v19 = vpop.f32.mrf.mxu1  ;;  %v189_v11 = vadd.f32 %v1214_v14, %v1196_v2  ;;  %v409_v2 = vmul.f32 0.5, %v1200_v5 }
  0xdf   :  { %962 = verf.f32 %v428_v13  ;;  %v451_v22 = vadd.f32 1.0, %v949_v16  ;;  %v1222_v23 = vadd.f32 %v851_v19, %v1173_v40  ;;  %v468_v26 = vmul.f32 %v452_v15, %v404_v17  ;;  %v1231_v38 = vpop.f32.mrf.mxu0 }
  0xe0   :  { %v951_v24 = vpop.eup %950  ;;  %v427_v27 = vmul.f32 0.70710677, %v1217_v18  ;;  %v374_v28 = vpop.f32.mrf.mxu1  ;;  %v410_v19 = vmul.f32 0.5, %v1194_v1 }
  0xe1   :  { %v467_v31 = vmul.f32 %v451_v22, %v403_v21  ;;  %v430_v32 = vmul.f32 0.70710677, %v1222_v23  ;;  %v454_v35 = vadd.f32 1.0, %v951_v24  ;;  %v1229_v36 = vadd.f32 %v1173_v40, %v374_v28  ;;  %v819_v60 = vpop.f32.mrf.mxu0 }
  0xe2   :  { %v953_v33 = vpop.eup %952  ;;  %964 = verf.f32 %v427_v27  ;;  %v854_v37 = vpop.f32.mrf.mxu1  ;;  %v484_v44 = vmul.f32 %v468_v26, %v174_v25 }
  0xe3   :  { %v483_v39 = vmul.f32 %v467_v31, %v169_v30  ;;  %966 = verf.f32 %v430_v32  ;;  %v453_v41 = vadd.f32 1.0, %v953_v33  ;;  %v1234_v42 = vadd.f32 %v854_v37, %v1173_v40  ;;  %v218_v17 = vpop.f32.mrf.mxu0 }
  0xe4   :  { %v955_v43 = vpop.eup %954  ;;  %v470_v46 = vmul.f32 %v454_v35, %v406_v29  ;;  %v429_v47 = vmul.f32 0.70710677, %v1229_v36  ;;  %v384_v48 = vpop.f32.mrf.mxu1  ;;  %v199_v29 = vadd.f32 %v1214_v14, %v1208_v10  ;;  %v412_v32 = vmul.f32 0.5, %v1206_v9 }
  0xe5   :  { %v469_v50 = vmul.f32 %v453_v41, %v405_v34  ;;  %v432_v51 = vmul.f32 0.70710677, %v1234_v42  ;;  %v456_v52 = vadd.f32 1.0, %v955_v43  ;;  %890 = vmatprep.mubr.f32.mxu0 %v483_v39  ;;  %v1246_v54 = vadd.f32 %v1173_v40, %v384_v48  ;;  %v822_v30 = vpop.f32.mrf.mxu0 }
  0xe6   :  { %v957_v53 = vpop.eup %956  ;;  %968 = verf.f32 %v429_v47  ;;  %v857_v59 = vpop.f32.mrf.mxu1  ;;  %891 = vmatmul.mubr.f32.vlgmr.msra.gmra.mxu0 %v484_v44  ;;  %v486_v4 = vmul.f32 %v470_v46, %v184_v45  ;;  %v411_v33 = vmul.f32 0.5, %v1217_v18  ;;  %v209_v10 = vadd.f32 %v1214_v14, %v1231_v38 }
  0xe7   :  { %v485_v63 = vmul.f32 %v469_v50, %v179_v49  ;;  %970 = verf.f32 %v432_v51  ;;  %v455_v0 = vadd.f32 1.0, %v957_v53  ;;  %v472_v7 = vmul.f32 %v456_v52, %v408_v55  ;;  %v228_v44 = vpop.f32.mrf.mxu0 }
  0xe8   :  { %v959_v3 = vpop.eup %958  ;;  %v431_v57 = vmul.f32 0.70710677, %v1246_v54  ;;  %v1251_v8 = vadd.f32 %v857_v59, %v1173_v40  ;;  %v394_v62 = vpop.f32.mrf.mxu1  ;;  %v414_v9 = vmul.f32 0.5, %v1222_v23  ;;  %v413_v18 = vmul.f32 0.5, %v1229_v36 }
  0xe9   :  { %v471_v12 = vmul.f32 %v455_v0, %v407_v58  ;;  %v458_v13 = vadd.f32 1.0, %v959_v3  ;;  %v1256_v15 = vadd.f32 %v1173_v40, %v394_v62  ;;  %893 = vmatprep.mubr.f32.mxu0 %v485_v63  ;;  %v488_v25 = vmul.f32 %v472_v7, %v194_v56  ;;  %v825_v53 = vpop.f32.mrf.mxu0 }
  0xea   :  { %v961_v61 = vpop.eup %960  ;;  %972 = verf.f32 %v431_v57  ;;  %v434_v16 = vmul.f32 0.70710677, %v1251_v8  ;;  %894 = vmatmul.mubr.f32.gmra.mxu0 %v486_v4  ;;  %v204_v40 = vadd.f32 %v1202_v6, %v1214_v14  ;;  %v214_v6 = vadd.f32 %v1219_v20, %v1214_v14 }
  0xeb   :  { %v487_v21 = vmul.f32 %v471_v12, %v189_v11  ;;  %v433_v22 = vmul.f32 0.70710677, %v1256_v15  ;;  %v457_v26 = vadd.f32 1.0, %v961_v61  ;;  %v474_v27 = vmul.f32 %v458_v13, %v410_v19  ;;  %v238_v62 = vpop.f32.mrf.mxu0 }
  0xec   :  { %v963_v24 = vpop.eup %962  ;;  %974 = verf.f32 %v434_v16  ;;  %v224_v20 = vadd.f32 %v819_v60, %v1214_v14  ;;  %v219_v52 = vadd.f32 %v1214_v14, %v218_v17  ;;  %v416_v56 = vmul.f32 0.5, %v1234_v42 }
  0xed   :  { %976 = verf.f32 %v433_v22  ;;  %v460_v28 = vadd.f32 1.0, %v963_v24  ;;  %896 = vmatprep.mubr.f32.mxu0 %v487_v21  ;;  %v473_v1 = vmul.f32 %v457_v26, %v409_v2  ;;  %v490_v37 = vmul.f32 %v474_v27, %v204_v40 }
  0xee   :  { %897 = vmatmul.mubr.f32.gmra.mxu0 %v488_v25  ;;  %v415_v23 = vmul.f32 0.5, %v1246_v54  ;;  %v234_v0 = vadd.f32 %v822_v30, %v1214_v14  ;;  %v229_v4 = vadd.f32 %v1214_v14, %v228_v44  ;;  %v418_v11 = vmul.f32 0.5, %v1251_v8  ;;  %v721_v8 = vld [vmem:[%s1357_s6] ss:$0 sm:$0xff] }
  0xef   :  { %v965_v31 = vpop.eup %964  ;;  %v489_v34 = vmul.f32 %v473_v1, %v199_v29  ;;  %v476_v39 = vmul.f32 %v460_v28, %v412_v32  ;;  %v417_v42 = vmul.f32 0.5, %v1256_v15  ;;  %v244_v13 = vadd.f32 %v825_v53, %v1214_v14 }
  0xf0   :  { %v967_v5 = vpop.eup %966  ;;  %v459_v35 = vadd.f32 1.0, %v965_v31  ;;  %v239_v17 = vadd.f32 %v1214_v14, %v238_v62 }
  0xf1   :  { %v462_v41 = vadd.f32 1.0, %v967_v5  ;;  %899 = vmatprep.mubr.f32.mxu0 %v489_v34  ;;  %v492_v49 = vmul.f32 %v476_v39, %v214_v6 }
  0xf2   :  { %v475_v43 = vmul.f32 %v459_v35, %v411_v33  ;;  %900 = vmatmul.mubr.f32.gmra.mxu0 %v490_v37 }
  0xf3   :  { %v969_v45 = vpop.eup %968  ;;  %v478_v50 = vmul.f32 %v462_v41, %v414_v9 }
  0xf4   :  { %v971_v46 = vpop.eup %970  ;;  %v491_v47 = vmul.f32 %v475_v43, %v209_v10  ;;  %v461_v48 = vadd.f32 1.0, %v969_v45 }
  0xf5   :  { %v464_v51 = vadd.f32 1.0, %v971_v46  ;;  %v494_v63 = vmul.f32 %v478_v50, %v224_v20 }
  0xf6   :  { %v477_v38 = vmul.f32 %v461_v48, %v413_v18  ;;  %902 = vmatprep.mubr.f32.mxu1 %v491_v47 }
  0xf7   :  { %v973_v55 = vpop.eup %972  ;;  %903 = vmatmul.mubr.f32.vlgmr.msra.gmra.mxu1 %v492_v49  ;;  %v480_v60 = vmul.f32 %v464_v51, %v416_v56 }
  0xf8   :  { %v493_v59 = vmul.f32 %v477_v38, %v219_v52  ;;  %v463_v36 = vadd.f32 1.0, %v973_v55 }
  0xf9   :  { %v975_v58 = vpop.eup %974  ;;  %v496_v61 = vmul.f32 %v480_v60, %v234_v0 }
  0xfa   :  { %v977_v3 = vpop.eup %976  ;;  %v479_v7 = vmul.f32 %v463_v36, %v415_v23  ;;  %v466_v57 = vadd.f32 1.0, %v975_v58  ;;  %905 = vmatprep.mubr.f32.mxu1 %v493_v59 }
  0xfb   :  { %v465_v12 = vadd.f32 1.0, %v977_v3  ;;  %906 = vmatmul.mubr.f32.gmra.mxu1 %v494_v63 }
  0xfc   :  { %v495_v54 = vmul.f32 %v479_v7, %v229_v4  ;;  %v482_v16 = vmul.f32 %v466_v57, %v418_v11 }
  0xfd   :  { %v481_v19 = vmul.f32 %v465_v12, %v417_v42 }
  0xfe   :  { %908 = vmatprep.mubr.f32.mxu1 %v495_v54  ;;  %v498_v22 = vmul.f32 %v482_v16, %v244_v13 }
  0xff   :  { %v497_v21 = vmul.f32 %v481_v19, %v239_v17  ;;  %909 = vmatmul.mubr.f32.gmra.mxu1 %v496_v61 }
 0x101   :  { %911 = vmatprep.mubr.f32.mxu1 %v497_v21 }
 0x103   :  { %912 = vmatmul.mubr.f32.gmra.mxu1 %v498_v22 }
 0x1a6   :  { %v892_v15 = vpop.f32.mrf.mxu0 }
 0x1a7   :  { %v594_v24 = vadd.f32 %v892_v15, %v721_v8 }
 0x1a8   :  { %v588_v2 = vpop.f32.mrf.mxu0 }
 0x1a9   :  { %668 = vst.msk [vmem:[%s1358_s7 + $0x8] sm:$0xff] %vm53_vm0, %v594_v24  ;;  %v589_v14 = vadd.f32 %v721_v8, %v588_v2 }
 0x1aa   :  { %v895_v25 = vpop.f32.mrf.mxu0 }
 0x1ab   :  { %667 = vst.msk [vmem:[%s1358_s7] sm:$0xff] %vm53_vm0, %v589_v14  ;;  %v604_v26 = vadd.f32 %v895_v25, %v721_v8 }
 0x1ac   :  { %v598_v40 = vpop.f32.mrf.mxu0 }
 0x1ad   :  { %670 = vst.msk [vmem:[%s1358_s7 + $0x18] sm:$0xff] %vm53_vm0, %v604_v26  ;;  %v599_v27 = vadd.f32 %v721_v8, %v598_v40 }
 0x1ae   :  { %v898_v28 = vpop.f32.mrf.mxu0 }
 0x1af   :  { %669 = vst.msk [vmem:[%s1358_s7 + $0x10] sm:$0xff] %vm53_vm0, %v599_v27  ;;  %v614_v29 = vadd.f32 %v898_v28, %v721_v8 }
 0x1b0   :  { %v608_v1 = vpop.f32.mrf.mxu0 }
 0x1b1   :  { %672 = vst.msk [vmem:[%s1358_s7 + $0x28] sm:$0xff] %vm53_vm0, %v614_v29  ;;  %v609_v30 = vadd.f32 %v721_v8, %v608_v1 }
 0x1b2   :  { %v901_v31 = vpop.f32.mrf.mxu0 }
 0x1b3   :  { %671 = vst.msk [vmem:[%s1358_s7 + $0x20] sm:$0xff] %vm53_vm0, %v609_v30  ;;  %v624_v32 = vadd.f32 %v901_v31, %v721_v8 }
 0x1b4   :  { %v618_v5 = vpop.f32.mrf.mxu0 }
 0x1b5   :  { %674 = vst.msk [vmem:[%s1358_s7 + $0x38] sm:$0xff] %vm53_vm0, %v624_v32  ;;  %v619_v33 = vadd.f32 %v721_v8, %v618_v5 }
 0x1b7   :  { %v904_v34 = vpop.f32.mrf.mxu1  ;;  %673 = vst.msk [vmem:[%s1358_s7 + $0x30] sm:$0xff] %vm53_vm0, %v619_v33 }
 0x1b8   :  { %v634_v35 = vadd.f32 %v904_v34, %v721_v8 }
 0x1b9   :  { %v628_v37 = vpop.f32.mrf.mxu1 }
 0x1ba   :  { %676 = vst.msk [vmem:[%s1358_s7 + $0x48] sm:$0xff] %vm53_vm0, %v634_v35  ;;  %v629_v6 = vadd.f32 %v721_v8, %v628_v37 }
 0x1bb   :  { %v907_v39 = vpop.f32.mrf.mxu1 }
 0x1bc   :  { %675 = vst.msk [vmem:[%s1358_s7 + $0x40] sm:$0xff] %vm53_vm0, %v629_v6  ;;  %v644_v41 = vadd.f32 %v907_v39, %v721_v8 }
 0x1bd   :  { %v638_v10 = vpop.f32.mrf.mxu1 }
 0x1be   :  { %678 = vst.msk [vmem:[%s1358_s7 + $0x58] sm:$0xff] %vm53_vm0, %v644_v41  ;;  %v639_v43 = vadd.f32 %v721_v8, %v638_v10 }
 0x1bf   :  { %v910_v44 = vpop.f32.mrf.mxu1 }
 0x1c0   :  { %677 = vst.msk [vmem:[%s1358_s7 + $0x50] sm:$0xff] %vm53_vm0, %v639_v43  ;;  %v654_v45 = vadd.f32 %v910_v44, %v721_v8 }
 0x1c1   :  { %v648_v9 = vpop.f32.mrf.mxu1 }
 0x1c2   :  { %680 = vst.msk [vmem:[%s1358_s7 + $0x68] sm:$0xff] %vm53_vm0, %v654_v45  ;;  %v649_v46 = vadd.f32 %v721_v8, %v648_v9 }
 0x1c3   :  { %v913_v18 = vpop.f32.mrf.mxu1 }
 0x1c4   :  { %679 = vst.msk [vmem:[%s1358_s7 + $0x60] sm:$0xff] %vm53_vm0, %v649_v46  ;;  %v664_v47 = vadd.f32 %v913_v18, %v721_v8 }
 0x1c5   :  { %v658_v48 = vpop.f32.mrf.mxu1 }
 0x1c6   :  { %682 = vst.msk [vmem:[%s1358_s7 + $0x78] sm:$0xff] %vm53_vm0, %v664_v47  ;;  %v659_v49 = vadd.f32 %v721_v8, %v658_v48 }
 0x1c8   :  { %681 = vst.msk [vmem:[%s1358_s7 + $0x70] sm:$0xff] %vm53_vm0, %v659_v49 }

// kernel: tpu_custom_call.1
= control target key start
LH: loop header
LB: loop body
LE: loop exit
PB: predicated region body
PF: predicated region fallthrough
CT: control target
= control target key end

     0   :  { %vm53_vm0 = vcmask 261120   ;;  %s1351_s2 = inlined_call_operand.vmem [shape: f32[32,128], index: 2, kind: input, shape index: {}]   ;;  %s1352_s0 = inlined_call_operand.vmem [shape: f32[128,32], index: 0, kind: input, shape index: {}]   ;;  %s1353_s1 = inlined_call_operand.vmem [shape: f32[32,128], index: 1, kind: input, shape index: {}]   ;;  %s1354_s5 = inlined_call_operand.vmem [shape: f32[128,32], index: 5, kind: input, shape index: {}]   ;;  %s1355_s4 = inlined_call_operand.vmem [shape: f32[1,128], index: 4, kind: input, shape index: {}]   ;;  %s1356_s3 = inlined_call_operand.vmem [shape: f32[1,128], index: 3, kind: input, shape index: {}]   ;;  %s1357_s6 = inlined_call_operand.vmem [shape: f32[1,32], index: 6, kind: input, shape index: {}]   ;;  %s1358_s7 = inlined_call_operand.vmem [shape: f32[128,32], index: 7, kind: output, shape index: {}]  }
   0x1   :  { %v250_v0 = vld [vmem:[%s1351_s2 + $0x18] sm:$0xff]  ;;  %v249_v1 = vld [vmem:[%s1351_s2 + $0x10] sm:$0xff]  ;;  %v26_v2 = vld [vmem:[%s1352_s0] sm:$0xff] }
   0x2   :  { %826 = vmatprep.subr.mxu1 %v250_v0  ;;  %v248_v3 = vld [vmem:[%s1351_s2 + $0x8] sm:$0xff]  ;;  %834 = vmatprep.mubr.msk.f32.mxu1 %vm53_vm0, %v26_v2  ;;  %v45_v4 = vld [vmem:[%s1353_s1 + $0x18] sm:$0xff]  ;;  %v247_v5 = vld [vmem:[%s1351_s2] sm:$0xff] }
   0x3   :  { %827 = vmatpush3.msra.mxu1 %v250_v0  ;;  %802 = vmatprep.mubr.msk.f32.mxu0 %vm53_vm0, %v26_v2  ;;  %v44_v6 = vld [vmem:[%s1353_s1 + $0x10] sm:$0xff]  ;;  %v43_v7 = vld [vmem:[%s1353_s1 + $0x8] sm:$0xff]  ;;  %v42_v10 = vld [vmem:[%s1353_s1] sm:$0xff] }
   0x4   :  { %828 = vmatprep.subr.mxu1 %v249_v1  ;;  %794 = vmatprep.subr.mxu0 %v45_v4  ;;  %v27_v8 = vld [vmem:[%s1352_s0 + $0x8] sm:$0xff]  ;;  %v28_v9 = vld [vmem:[%s1352_s0 + $0x10] sm:$0xff]  ;;  %v514_v11 = vld [vmem:[%s1354_s5 + $0x78] sm:$0xff] }
   0x5   :  { %829 = vmatpush3.msra.mxu1 %v249_v1  ;;  %795 = vmatpush3.msra.mxu0 %v45_v4  ;;  %v29_v12 = vld [vmem:[%s1352_s0 + $0x18] sm:$0xff]  ;;  %v30_v13 = vld [vmem:[%s1352_s0 + $0x20] sm:$0xff]  ;;  %v513_v14 = vld [vmem:[%s1354_s5 + $0x70] sm:$0xff] }
   0x6   :  { %830 = vmatprep.subr.mxu1 %v248_v3  ;;  %796 = vmatprep.subr.mxu0 %v44_v6  ;;  %v31_v15 = vld [vmem:[%s1352_s0 + $0x28] sm:$0xff]  ;;  %v32_v16 = vld [vmem:[%s1352_s0 + $0x30] sm:$0xff]  ;;  %v33_v17 = vld [vmem:[%s1352_s0 + $0x38] sm:$0xff] }
   0x7   :  { %831 = vmatpush3.msra.mxu1 %v248_v3  ;;  %797 = vmatpush3.msra.mxu0 %v44_v6  ;;  %v34_v18 = vld [vmem:[%s1352_s0 + $0x40] sm:$0xff]  ;;  %v35_v19 = vld [vmem:[%s1352_s0 + $0x48] sm:$0xff]  ;;  %v36_v20 = vld [vmem:[%s1352_s0 + $0x50] sm:$0xff] }
   0x8   :  { %832 = vmatprep.subr.mxu1 %v247_v5  ;;  %798 = vmatprep.subr.mxu0 %v43_v7  ;;  %v37_v21 = vld [vmem:[%s1352_s0 + $0x58] sm:$0xff]  ;;  %v38_v22 = vld [vmem:[%s1352_s0 + $0x60] sm:$0xff]  ;;  %v39_v23 = vld [vmem:[%s1352_s0 + $0x68] sm:$0xff] }
   0x9   :  { %833 = vmatpush3.msra.mxu1 %v247_v5  ;;  %799 = vmatpush3.msra.mxu0 %v43_v7  ;;  %v40_v24 = vld [vmem:[%s1352_s0 + $0x70] sm:$0xff]  ;;  %v41_v25 = vld [vmem:[%s1352_s0 + $0x78] sm:$0xff]  ;;  %v512_v26 = vld [vmem:[%s1354_s5 + $0x68] sm:$0xff] }
   0xa   :  { %835 = vmatmul.mubr.msk.f32.vlgmr.msra.gmra.mxu1 %vm53_vm0, %v27_v8  ;;  %800 = vmatprep.subr.mxu0 %v42_v10  ;;  %v511_v27 = vld [vmem:[%s1354_s5 + $0x60] sm:$0xff]  ;;  %v510_v28 = vld [vmem:[%s1354_s5 + $0x58] sm:$0xff]  ;;  %v509_v29 = vld [vmem:[%s1354_s5 + $0x50] sm:$0xff] }
   0xb   :  { %837 = vmatprep.mubr.msk.f32.mxu1 %vm53_vm0, %v28_v9  ;;  %801 = vmatpush3.msra.mxu0 %v42_v10  ;;  %v508_v30 = vld [vmem:[%s1354_s5 + $0x48] sm:$0xff]  ;;  %v507_v31 = vld [vmem:[%s1354_s5 + $0x40] sm:$0xff]  ;;  %v506_v32 = vld [vmem:[%s1354_s5 + $0x38] sm:$0xff] }
   0xc   :  { %914 = vmatprep.subr.mxu1 %v514_v11  ;;  %803 = vmatmul.mubr.msk.f32.vlgmr.msra.gmra.mxu0 %vm53_vm0, %v27_v8  ;;  %v505_v33 = vld [vmem:[%s1354_s5 + $0x30] sm:$0xff]  ;;  %v504_v34 = vld [vmem:[%s1354_s5 + $0x28] sm:$0xff]  ;;  %v503_v35 = vld [vmem:[%s1354_s5 + $0x20] sm:$0xff] }
   0xd   :  { %858 = vmatprep.subr.mxu0 %v514_v11  ;;  %805 = vmatprep.mubr.msk.f32.mxu0 %vm53_vm0, %v28_v9  ;;  %v502_v36 = vld [vmem:[%s1354_s5 + $0x18] sm:$0xff]  ;;  %v501_v37 = vld [vmem:[%s1354_s5 + $0x10] sm:$0xff]  ;;  %v500_v38 = vld [vmem:[%s1354_s5 + $0x8] sm:$0xff] }
   0xe   :  { %838 = vmatmul.mubr.msk.f32.gmra.mxu1 %vm53_vm0, %v29_v12  ;;  %859 = vmatpush3.msra.mxu0 %v514_v11  ;;  %v499_v39 = vld [vmem:[%s1354_s5] sm:$0xff] }
   0xf   :  { %840 = vmatprep.mubr.msk.f32.mxu1 %vm53_vm0, %v30_v13  ;;  %860 = vmatprep.subr.mxu0 %v513_v14  ;;  %v1173_v40 = vld [vmem:[%s1355_s4] ss:$0 sm:$0xff] }
  0x10   :  { %930 = vmatpush3.msra.mxu1 %v514_v11  ;;  %806 = vmatmul.mubr.msk.f32.gmra.mxu0 %vm53_vm0, %v29_v12 }
  0x11   :  { %915 = vmatprep.subr.mxu1 %v513_v14  ;;  %808 = vmatprep.mubr.msk.f32.mxu0 %vm53_vm0, %v30_v13 }
  0x12   :  { %841 = vmatmul.mubr.msk.f32.gmra.mxu1 %vm53_vm0, %v31_v15  ;;  %861 = vmatpush3.msra.mxu0 %v513_v14 }
  0x13   :  { %843 = vmatprep.mubr.msk.f32.mxu1 %vm53_vm0, %v32_v16  ;;  %931 = vmatpush3.msra.mxu1 %v513_v14  ;;  %v1214_v14 = vld [vmem:[%s1356_s3] ss:$0 sm:$0xff] }
  0x14   :  { %809 = vmatmul.mubr.msk.f32.gmra.mxu0 %vm53_vm0, %v31_v15  ;;  %862 = vmatprep.subr.mxu0 %v512_v26 }
  0x15   :  { %811 = vmatprep.mubr.msk.f32.mxu0 %vm53_vm0, %v32_v16  ;;  %916 = vmatprep.subr.mxu1 %v512_v26 }
  0x16   :  { %844 = vmatmul.mubr.msk.f32.gmra.mxu1 %vm53_vm0, %v33_v17  ;;  %863 = vmatpush3.msra.mxu0 %v512_v26 }
  0x17   :  { %846 = vmatprep.mubr.msk.f32.mxu1 %vm53_vm0, %v34_v18  ;;  %932 = vmatpush3.msra.mxu1 %v512_v26 }
  0x18   :  { %812 = vmatmul.mubr.msk.f32.gmra.mxu0 %vm53_vm0, %v33_v17  ;;  %864 = vmatprep.subr.mxu0 %v511_v27 }
  0x19   :  { %814 = vmatprep.mubr.msk.f32.mxu0 %vm53_vm0, %v34_v18  ;;  %917 = vmatprep.subr.mxu1 %v511_v27 }
  0x1a   :  { %847 = vmatmul.mubr.msk.f32.gmra.mxu1 %vm53_vm0, %v35_v19  ;;  %865 = vmatpush3.msra.mxu0 %v511_v27 }
  0x1b   :  { %849 = vmatprep.mubr.msk.f32.mxu1 %vm53_vm0, %v36_v20  ;;  %933 = vmatpush3.msra.mxu1 %v511_v27 }
  0x1c   :  { %815 = vmatmul.mubr.msk.f32.gmra.mxu0 %vm53_vm0, %v35_v19  ;;  %866 = vmatprep.subr.mxu0 %v510_v28 }
  0x1d   :  { %817 = vmatprep.mubr.msk.f32.mxu0 %vm53_vm0, %v36_v20  ;;  %918 = vmatprep.subr.mxu1 %v510_v28 }
  0x1e   :  { %850 = vmatmul.mubr.msk.f32.gmra.mxu1 %vm53_vm0, %v37_v21  ;;  %867 = vmatpush3.msra.mxu0 %v510_v28 }
  0x1f   :  { %852 = vmatprep.mubr.msk.f32.mxu1 %vm53_vm0, %v38_v22  ;;  %934 = vmatpush3.msra.mxu1 %v510_v28 }
  0x20   :  { %818 = vmatmul.mubr.msk.f32.gmra.mxu0 %vm53_vm0, %v37_v21  ;;  %868 = vmatprep.subr.mxu0 %v509_v29 }
  0x21   :  { %820 = vmatprep.mubr.msk.f32.mxu0 %vm53_vm0, %v38_v22  ;;  %919 = vmatprep.subr.mxu1 %v509_v29 }
  0x22   :  { %853 = vmatmul.mubr.msk.f32.gmra.mxu1 %vm53_vm0, %v39_v23  ;;  %869 = vmatpush3.msra.mxu0 %v509_v29 }
  0x23   :  { %855 = vmatprep.mubr.msk.f32.mxu1 %vm53_vm0, %v40_v24  ;;  %935 = vmatpush3.msra.mxu1 %v509_v29 }
  0x24   :  { %821 = vmatmul.mubr.msk.f32.gmra.mxu0 %vm53_vm0, %v39_v23  ;;  %870 = vmatprep.subr.mxu0 %v508_v30 }
  0x25   :  { %823 = vmatprep.mubr.msk.f32.mxu0 %vm53_vm0, %v40_v24  ;;  %920 = vmatprep.subr.mxu1 %v508_v30 }
  0x26   :  { %856 = vmatmul.mubr.msk.f32.gmra.mxu1 %vm53_vm0, %v41_v25  ;;  %871 = vmatpush3.msra.mxu0 %v508_v30 }
  0x27   :  { %936 = vmatpush3.msra.mxu1 %v508_v30  ;;  %872 = vmatprep.subr.mxu0 %v507_v31 }
  0x28   :  { %824 = vmatmul.mubr.msk.f32.gmra.mxu0 %vm53_vm0, %v41_v25  ;;  %921 = vmatprep.subr.mxu1 %v507_v31 }
  0x29   :  { %873 = vmatpush3.msra.mxu0 %v507_v31  ;;  %937 = vmatpush3.msra.mxu1 %v507_v31 }
  0x2a   :  { %874 = vmatprep.subr.mxu0 %v506_v32  ;;  %922 = vmatprep.subr.mxu1 %v506_v32 }
  0x2b   :  { %875 = vmatpush3.msra.mxu0 %v506_v32  ;;  %938 = vmatpush3.msra.mxu1 %v506_v32 }
  0x2c   :  { %876 = vmatprep.subr.mxu0 %v505_v33  ;;  %923 = vmatprep.subr.mxu1 %v505_v33 }
  0x2d   :  { %877 = vmatpush3.msra.mxu0 %v505_v33  ;;  %939 = vmatpush3.msra.mxu1 %v505_v33 }
  0x2e   :  { %878 = vmatprep.subr.mxu0 %v504_v34  ;;  %924 = vmatprep.subr.mxu1 %v504_v34 }
  0x2f   :  { %879 = vmatpush3.msra.mxu0 %v504_v34  ;;  %940 = vmatpush3.msra.mxu1 %v504_v34 }
  0x30   :  { %880 = vmatprep.subr.mxu0 %v503_v35  ;;  %925 = vmatprep.subr.mxu1 %v503_v35 }
  0x31   :  { %881 = vmatpush3.msra.mxu0 %v503_v35  ;;  %941 = vmatpush3.msra.mxu1 %v503_v35 }
  0x32   :  { %882 = vmatprep.subr.mxu0 %v502_v36  ;;  %926 = vmatprep.subr.mxu1 %v502_v36 }
  0x33   :  { %883 = vmatpush3.msra.mxu0 %v502_v36  ;;  %942 = vmatpush3.msra.mxu1 %v502_v36 }
  0x34   :  { %884 = vmatprep.subr.mxu0 %v501_v37  ;;  %927 = vmatprep.subr.mxu1 %v501_v37 }
  0x35   :  { %885 = vmatpush3.msra.mxu0 %v501_v37  ;;  %943 = vmatpush3.msra.mxu1 %v501_v37 }
  0x36   :  { %886 = vmatprep.subr.mxu0 %v500_v38  ;;  %928 = vmatprep.subr.mxu1 %v500_v38 }
  0x37   :  { %887 = vmatpush3.msra.mxu0 %v500_v38  ;;  %944 = vmatpush3.msra.mxu1 %v500_v38 }
  0x38   :  { %888 = vmatprep.subr.mxu0 %v499_v39  ;;  %929 = vmatprep.subr.mxu1 %v499_v39 }
  0x39   :  { %889 = vmatpush3.msra.mxu0 %v499_v39  ;;  %945 = vmatpush3.msra.mxu1 %v499_v39 }
  0xca   :  { %v836_v41 = vpop.f32.mrf.mxu1 }
  0xcb   :  { %v330_v42 = vadd.f32 %v836_v41, %v1173_v40 }
  0xcc   :  { %v324_v43 = vpop.f32.mrf.mxu1  ;;  %v804_v46 = vpop.f32.mrf.mxu0 }
  0xcd   :  { %v420_v44 = vmul.f32 0.70710677, %v330_v42  ;;  %v325_v45 = vadd.f32 %v1173_v40, %v324_v43  ;;  %v404_v17 = vmul.f32 0.5, %v330_v42  ;;  %v174_v25 = vadd.f32 %v804_v46, %v1214_v14 }
  0xce   :  { %v839_v47 = vpop.f32.mrf.mxu1  ;;  %v168_v50 = vpop.f32.mrf.mxu0 }
  0xcf   :  { %946 = verf.f32 %v420_v44  ;;  %v419_v48 = vmul.f32 0.70710677, %v325_v45  ;;  %v340_v49 = vadd.f32 %v839_v47, %v1173_v40  ;;  %v403_v21 = vmul.f32 0.5, %v325_v45 }
  0xd0   :  { %v334_v51 = vpop.f32.mrf.mxu1  ;;  %v1179_v54 = vpop.f32.mrf.mxu0  ;;  %v169_v30 = vadd.f32 %v1214_v14, %v168_v50 }
  0xd1   :  { %948 = verf.f32 %v419_v48  ;;  %v422_v52 = vmul.f32 0.70710677, %v340_v49  ;;  %v335_v53 = vadd.f32 %v1173_v40, %v334_v51  ;;  %v406_v29 = vmul.f32 0.5, %v340_v49 }
  0xd2   :  { %v842_v55 = vpop.f32.mrf.mxu1  ;;  %v1184_v58 = vpop.f32.mrf.mxu0  ;;  %v184_v45 = vadd.f32 %v1179_v54, %v1214_v14 }
  0xd3   :  { %950 = verf.f32 %v422_v52  ;;  %v421_v56 = vmul.f32 0.70710677, %v335_v53  ;;  %v1182_v57 = vadd.f32 %v842_v55, %v1173_v40  ;;  %v405_v34 = vmul.f32 0.5, %v335_v53 }
  0xd4   :  { %v344_v59 = vpop.f32.mrf.mxu1  ;;  %v1190_v62 = vpop.f32.mrf.mxu0  ;;  %v179_v49 = vadd.f32 %v1214_v14, %v1184_v58 }
  0xd5   :  { %952 = verf.f32 %v421_v56  ;;  %v424_v60 = vmul.f32 0.70710677, %v1182_v57  ;;  %v1188_v61 = vadd.f32 %v1173_v40, %v344_v59  ;;  %v408_v55 = vmul.f32 0.5, %v1182_v57 }
  0xd6   :  { %v845_v63 = vpop.f32.mrf.mxu1  ;;  %v1196_v2 = vpop.f32.mrf.mxu0  ;;  %v194_v56 = vadd.f32 %v1190_v62, %v1214_v14 }
  0xd7   :  { %954 = verf.f32 %v424_v60  ;;  %v423_v0 = vmul.f32 0.70710677, %v1188_v61  ;;  %v1194_v1 = vadd.f32 %v845_v63, %v1173_v40  ;;  %v407_v58 = vmul.f32 0.5, %v1188_v61 }
  0xd8   :  { %v354_v3 = vpop.f32.mrf.mxu1  ;;  %v1202_v6 = vpop.f32.mrf.mxu0 }
  0xd9   :  { %956 = verf.f32 %v423_v0  ;;  %v426_v4 = vmul.f32 0.70710677, %v1194_v1  ;;  %v1200_v5 = vadd.f32 %v1173_v40, %v354_v3 }
  0xda   :  { %v848_v7 = vpop.f32.mrf.mxu1  ;;  %v1208_v10 = vpop.f32.mrf.mxu0 }
  0xdb   :  { %958 = verf.f32 %v426_v4  ;;  %v425_v8 = vmul.f32 0.70710677, %v1200_v5  ;;  %v1206_v9 = vadd.f32 %v848_v7, %v1173_v40 }
  0xdc   :  { %v947_v11 = vpop.eup %946  ;;  %v364_v12 = vpop.f32.mrf.mxu1 }
  0xdd   :  { %960 = verf.f32 %v425_v8  ;;  %v428_v13 = vmul.f32 0.70710677, %v1206_v9  ;;  %v452_v15 = vadd.f32 1.0, %v947_v11  ;;  %v1217_v18 = vadd.f32 %v1173_v40, %v364_v12  ;;  %v1219_v20 = vpop.f32.mrf.mxu0 }
  0xde   :  { %v949_v16 = vpop.eup %948  ;;  %v851_v19 = vpop.f32.mrf.mxu1  ;;  %v189_v11 = vadd.f32 %v1214_v14, %v1196_v2  ;;  %v409_v2 = vmul.f32 0.5, %v1200_v5 }
  0xdf   :  { %962 = verf.f32 %v428_v13  ;;  %v451_v22 = vadd.f32 1.0, %v949_v16  ;;  %v1222_v23 = vadd.f32 %v851_v19, %v1173_v40  ;;  %v468_v26 = vmul.f32 %v452_v15, %v404_v17  ;;  %v1231_v38 = vpop.f32.mrf.mxu0 }
  0xe0   :  { %v951_v24 = vpop.eup %950  ;;  %v427_v27 = vmul.f32 0.70710677, %v1217_v18  ;;  %v374_v28 = vpop.f32.mrf.mxu1  ;;  %v410_v19 = vmul.f32 0.5, %v1194_v1 }
  0xe1   :  { %v467_v31 = vmul.f32 %v451_v22, %v403_v21  ;;  %v430_v32 = vmul.f32 0.70710677, %v1222_v23  ;;  %v454_v35 = vadd.f32 1.0, %v951_v24  ;;  %v1229_v36 = vadd.f32 %v1173_v40, %v374_v28  ;;  %v819_v60 = vpop.f32.mrf.mxu0 }
  0xe2   :  { %v953_v33 = vpop.eup %952  ;;  %964 = verf.f32 %v427_v27  ;;  %v854_v37 = vpop.f32.mrf.mxu1  ;;  %v484_v44 = vmul.f32 %v468_v26, %v174_v25 }
  0xe3   :  { %v483_v39 = vmul.f32 %v467_v31, %v169_v30  ;;  %966 = verf.f32 %v430_v32  ;;  %v453_v41 = vadd.f32 1.0, %v953_v33  ;;  %v1234_v42 = vadd.f32 %v854_v37, %v1173_v40  ;;  %v218_v17 = vpop.f32.mrf.mxu0 }
  0xe4   :  { %v955_v43 = vpop.eup %954  ;;  %v470_v46 = vmul.f32 %v454_v35, %v406_v29  ;;  %v429_v47 = vmul.f32 0.70710677, %v1229_v36  ;;  %v384_v48 = vpop.f32.mrf.mxu1  ;;  %v199_v29 = vadd.f32 %v1214_v14, %v1208_v10  ;;  %v412_v32 = vmul.f32 0.5, %v1206_v9 }
  0xe5   :  { %v469_v50 = vmul.f32 %v453_v41, %v405_v34  ;;  %v432_v51 = vmul.f32 0.70710677, %v1234_v42  ;;  %v456_v52 = vadd.f32 1.0, %v955_v43  ;;  %890 = vmatprep.mubr.f32.mxu0 %v483_v39  ;;  %v1246_v54 = vadd.f32 %v1173_v40, %v384_v48  ;;  %v822_v30 = vpop.f32.mrf.mxu0 }
  0xe6   :  { %v957_v53 = vpop.eup %956  ;;  %968 = verf.f32 %v429_v47  ;;  %v857_v59 = vpop.f32.mrf.mxu1  ;;  %891 = vmatmul.mubr.f32.vlgmr.msra.gmra.mxu0 %v484_v44  ;;  %v486_v4 = vmul.f32 %v470_v46, %v184_v45  ;;  %v411_v33 = vmul.f32 0.5, %v1217_v18  ;;  %v209_v10 = vadd.f32 %v1214_v14, %v1231_v38 }
  0xe7   :  { %v485_v63 = vmul.f32 %v469_v50, %v179_v49  ;;  %970 = verf.f32 %v432_v51  ;;  %v455_v0 = vadd.f32 1.0, %v957_v53  ;;  %v472_v7 = vmul.f32 %v456_v52, %v408_v55  ;;  %v228_v44 = vpop.f32.mrf.mxu0 }
  0xe8   :  { %v959_v3 = vpop.eup %958  ;;  %v431_v57 = vmul.f32 0.70710677, %v1246_v54  ;;  %v1251_v8 = vadd.f32 %v857_v59, %v1173_v40  ;;  %v394_v62 = vpop.f32.mrf.mxu1  ;;  %v414_v9 = vmul.f32 0.5, %v1222_v23  ;;  %v413_v18 = vmul.f32 0.5, %v1229_v36 }
  0xe9   :  { %v471_v12 = vmul.f32 %v455_v0, %v407_v58  ;;  %v458_v13 = vadd.f32 1.0, %v959_v3  ;;  %v1256_v15 = vadd.f32 %v1173_v40, %v394_v62  ;;  %893 = vmatprep.mubr.f32.mxu0 %v485_v63  ;;  %v488_v25 = vmul.f32 %v472_v7, %v194_v56  ;;  %v825_v53 = vpop.f32.mrf.mxu0 }
  0xea   :  { %v961_v61 = vpop.eup %960  ;;  %972 = verf.f32 %v431_v57  ;;  %v434_v16 = vmul.f32 0.70710677, %v1251_v8  ;;  %894 = vmatmul.mubr.f32.gmra.mxu0 %v486_v4  ;;  %v204_v40 = vadd.f32 %v1202_v6, %v1214_v14  ;;  %v214_v6 = vadd.f32 %v1219_v20, %v1214_v14 }
  0xeb   :  { %v487_v21 = vmul.f32 %v471_v12, %v189_v11  ;;  %v433_v22 = vmul.f32 0.70710677, %v1256_v15  ;;  %v457_v26 = vadd.f32 1.0, %v961_v61  ;;  %v474_v27 = vmul.f32 %v458_v13, %v410_v19  ;;  %v238_v62 = vpop.f32.mrf.mxu0 }
  0xec   :  { %v963_v24 = vpop.eup %962  ;;  %974 = verf.f32 %v434_v16  ;;  %v224_v20 = vadd.f32 %v819_v60, %v1214_v14  ;;  %v219_v52 = vadd.f32 %v1214_v14, %v218_v17  ;;  %v416_v56 = vmul.f32 0.5, %v1234_v42 }
  0xed   :  { %976 = verf.f32 %v433_v22  ;;  %v460_v28 = vadd.f32 1.0, %v963_v24  ;;  %896 = vmatprep.mubr.f32.mxu0 %v487_v21  ;;  %v473_v1 = vmul.f32 %v457_v26, %v409_v2  ;;  %v490_v37 = vmul.f32 %v474_v27, %v204_v40 }
  0xee   :  { %897 = vmatmul.mubr.f32.gmra.mxu0 %v488_v25  ;;  %v415_v23 = vmul.f32 0.5, %v1246_v54  ;;  %v234_v0 = vadd.f32 %v822_v30, %v1214_v14  ;;  %v229_v4 = vadd.f32 %v1214_v14, %v228_v44  ;;  %v418_v11 = vmul.f32 0.5, %v1251_v8  ;;  %v721_v8 = vld [vmem:[%s1357_s6] ss:$0 sm:$0xff] }
  0xef   :  { %v965_v31 = vpop.eup %964  ;;  %v489_v34 = vmul.f32 %v473_v1, %v199_v29  ;;  %v476_v39 = vmul.f32 %v460_v28, %v412_v32  ;;  %v417_v42 = vmul.f32 0.5, %v1256_v15  ;;  %v244_v13 = vadd.f32 %v825_v53, %v1214_v14 }
  0xf0   :  { %v967_v5 = vpop.eup %966  ;;  %v459_v35 = vadd.f32 1.0, %v965_v31  ;;  %v239_v17 = vadd.f32 %v1214_v14, %v238_v62 }
  0xf1   :  { %v462_v41 = vadd.f32 1.0, %v967_v5  ;;  %899 = vmatprep.mubr.f32.mxu0 %v489_v34  ;;  %v492_v49 = vmul.f32 %v476_v39, %v214_v6 }
  0xf2   :  { %v475_v43 = vmul.f32 %v459_v35, %v411_v33  ;;  %900 = vmatmul.mubr.f32.gmra.mxu0 %v490_v37 }
  0xf3   :  { %v969_v45 = vpop.eup %968  ;;  %v478_v50 = vmul.f32 %v462_v41, %v414_v9 }
  0xf4   :  { %v971_v46 = vpop.eup %970  ;;  %v491_v47 = vmul.f32 %v475_v43, %v209_v10  ;;  %v461_v48 = vadd.f32 1.0, %v969_v45 }
  0xf5   :  { %v464_v51 = vadd.f32 1.0, %v971_v46  ;;  %v494_v63 = vmul.f32 %v478_v50, %v224_v20 }
  0xf6   :  { %v477_v38 = vmul.f32 %v461_v48, %v413_v18  ;;  %902 = vmatprep.mubr.f32.mxu1 %v491_v47 }
  0xf7   :  { %v973_v55 = vpop.eup %972  ;;  %903 = vmatmul.mubr.f32.vlgmr.msra.gmra.mxu1 %v492_v49  ;;  %v480_v60 = vmul.f32 %v464_v51, %v416_v56 }
  0xf8   :  { %v493_v59 = vmul.f32 %v477_v38, %v219_v52  ;;  %v463_v36 = vadd.f32 1.0, %v973_v55 }
  0xf9   :  { %v975_v58 = vpop.eup %974  ;;  %v496_v61 = vmul.f32 %v480_v60, %v234_v0 }
  0xfa   :  { %v977_v3 = vpop.eup %976  ;;  %v479_v7 = vmul.f32 %v463_v36, %v415_v23  ;;  %v466_v57 = vadd.f32 1.0, %v975_v58  ;;  %905 = vmatprep.mubr.f32.mxu1 %v493_v59 }
  0xfb   :  { %v465_v12 = vadd.f32 1.0, %v977_v3  ;;  %906 = vmatmul.mubr.f32.gmra.mxu1 %v494_v63 }
  0xfc   :  { %v495_v54 = vmul.f32 %v479_v7, %v229_v4  ;;  %v482_v16 = vmul.f32 %v466_v57, %v418_v11 }
  0xfd   :  { %v481_v19 = vmul.f32 %v465_v12, %v417_v42 }
  0xfe   :  { %908 = vmatprep.mubr.f32.mxu1 %v495_v54  ;;  %v498_v22 = vmul.f32 %v482_v16, %v244_v13 }
  0xff   :  { %v497_v21 = vmul.f32 %v481_v19, %v239_v17  ;;  %909 = vmatmul.mubr.f32.gmra.mxu1 %v496_v61 }
 0x101   :  { %911 = vmatprep.mubr.f32.mxu1 %v497_v21 }
 0x103   :  { %912 = vmatmul.mubr.f32.gmra.mxu1 %v498_v22 }
 0x1a6   :  { %v892_v15 = vpop.f32.mrf.mxu0 }
 0x1a7   :  { %v594_v24 = vadd.f32 %v892_v15, %v721_v8 }
 0x1a8   :  { %v588_v2 = vpop.f32.mrf.mxu0 }
 0x1a9   :  { %668 = vst.msk [vmem:[%s1358_s7 + $0x8] sm:$0xff] %vm53_vm0, %v594_v24  ;;  %v589_v14 = vadd.f32 %v721_v8, %v588_v2 }
 0x1aa   :  { %v895_v25 = vpop.f32.mrf.mxu0 }
 0x1ab   :  { %667 = vst.msk [vmem:[%s1358_s7] sm:$0xff] %vm53_vm0, %v589_v14  ;;  %v604_v26 = vadd.f32 %v895_v25, %v721_v8 }
 0x1ac   :  { %v598_v40 = vpop.f32.mrf.mxu0 }
 0x1ad   :  { %670 = vst.msk [vmem:[%s1358_s7 + $0x18] sm:$0xff] %vm53_vm0, %v604_v26  ;;  %v599_v27 = vadd.f32 %v721_v8, %v598_v40 }
 0x1ae   :  { %v898_v28 = vpop.f32.mrf.mxu0 }
 0x1af   :  { %669 = vst.msk [vmem:[%s1358_s7 + $0x10] sm:$0xff] %vm53_vm0, %v599_v27  ;;  %v614_v29 = vadd.f32 %v898_v28, %v721_v8 }
 0x1b0   :  { %v608_v1 = vpop.f32.mrf.mxu0 }
 0x1b1   :  { %672 = vst.msk [vmem:[%s1358_s7 + $0x28] sm:$0xff] %vm53_vm0, %v614_v29  ;;  %v609_v30 = vadd.f32 %v721_v8, %v608_v1 }
 0x1b2   :  { %v901_v31 = vpop.f32.mrf.mxu0 }
 0x1b3   :  { %671 = vst.msk [vmem:[%s1358_s7 + $0x20] sm:$0xff] %vm53_vm0, %v609_v30  ;;  %v624_v32 = vadd.f32 %v901_v31, %v721_v8 }
 0x1b4   :  { %v618_v5 = vpop.f32.mrf.mxu0 }
 0x1b5   :  { %674 = vst.msk [vmem:[%s1358_s7 + $0x38] sm:$0xff] %vm53_vm0, %v624_v32  ;;  %v619_v33 = vadd.f32 %v721_v8, %v618_v5 }
 0x1b7   :  { %v904_v34 = vpop.f32.mrf.mxu1  ;;  %673 = vst.msk [vmem:[%s1358_s7 + $0x30] sm:$0xff] %vm53_vm0, %v619_v33 }
 0x1b8   :  { %v634_v35 = vadd.f32 %v904_v34, %v721_v8 }
 0x1b9   :  { %v628_v37 = vpop.f32.mrf.mxu1 }
 0x1ba   :  { %676 = vst.msk [vmem:[%s1358_s7 + $0x48] sm:$0xff] %vm53_vm0, %v634_v35  ;;  %v629_v6 = vadd.f32 %v721_v8, %v628_v37 }
 0x1bb   :  { %v907_v39 = vpop.f32.mrf.mxu1 }
 0x1bc   :  { %675 = vst.msk [vmem:[%s1358_s7 + $0x40] sm:$0xff] %vm53_vm0, %v629_v6  ;;  %v644_v41 = vadd.f32 %v907_v39, %v721_v8 }
 0x1bd   :  { %v638_v10 = vpop.f32.mrf.mxu1 }
 0x1be   :  { %678 = vst.msk [vmem:[%s1358_s7 + $0x58] sm:$0xff] %vm53_vm0, %v644_v41  ;;  %v639_v43 = vadd.f32 %v721_v8, %v638_v10 }
 0x1bf   :  { %v910_v44 = vpop.f32.mrf.mxu1 }
 0x1c0   :  { %677 = vst.msk [vmem:[%s1358_s7 + $0x50] sm:$0xff] %vm53_vm0, %v639_v43  ;;  %v654_v45 = vadd.f32 %v910_v44, %v721_v8 }
 0x1c1   :  { %v648_v9 = vpop.f32.mrf.mxu1 }
 0x1c2   :  { %680 = vst.msk [vmem:[%s1358_s7 + $0x68] sm:$0xff] %vm53_vm0, %v654_v45  ;;  %v649_v46 = vadd.f32 %v721_v8, %v648_v9 }
 0x1c3   :  { %v913_v18 = vpop.f32.mrf.mxu1 }
 0x1c4   :  { %679 = vst.msk [vmem:[%s1358_s7 + $0x60] sm:$0xff] %vm53_vm0, %v649_v46  ;;  %v664_v47 = vadd.f32 %v913_v18, %v721_v8 }
 0x1c5   :  { %v658_v48 = vpop.f32.mrf.mxu1 }
 0x1c6   :  { %682 = vst.msk [vmem:[%s1358_s7 + $0x78] sm:$0xff] %vm53_vm0, %v664_v47  ;;  %v659_v49 = vadd.f32 %v721_v8, %v658_v48 }
 0x1c8   :  { %681 = vst.msk [vmem:[%s1358_s7 + $0x70] sm:$0xff] %vm53_vm0, %v659_v49 }

</bundles_post_ra>
